<compile_context>
chip_gen: v6e
topology: v6e:2x2x1
jax: 0.10.0
libtpu: 0.0.40
codegen_flags: <defaults>
</compile_context>

<pallas_src>
import functools

import jax
import jax.numpy as jnp
import numpy as np
from jax import lax
from jax.experimental import pallas as pl
from jax.experimental.pallas import tpu as pltpu

# dot_general dimension numbers (no explicit transposes materialized):
_NT = (((1,), (1,)), ((), ()))   # contract last dim of both   (A @ B^T)
_TN = (((0,), (0,)), ((), ()))   # contract first dim of both  (A^T @ B)


def _round_up(x, m):
    return ((x + m - 1) // m) * m


# ----------------------------------------------------------------------------
# Kernel 1: fused both-branch projection  q = x @ [W_lin(add); W_lin(diff)]^T
# One grid step, lane-dense (2*H*D-wide, zero-padded to a multiple of 128) out.
# ----------------------------------------------------------------------------
def _proj_kernel(x_ref, w_ref, q_ref):
    q_ref[...] = lax.dot_general(x_ref[...], w_ref[...], _NT,
                                 preferred_element_type=jnp.float32)


# ----------------------------------------------------------------------------
# Kernel 2: fused anchor attention + dense anchor graph conv, one step / branch
# ----------------------------------------------------------------------------
def _attn_gnn_kernel(q_ref, x_ref, e_ref, wb_ref, wc_ref, wrel_ref, wroot_ref,
                     brel_ref, o_ref, aq_buf, *, heads, K, tau):
    br = pl.program_id(0)      # 0 = add branch (logits - b), 1 = diff branch (+ b)
    N = x_ref.shape[0]
    A = e_ref.shape[1]

    # ---- anchor projection + global Frobenius norms (unrolled head loop) ----
    def proj_body(h, carry):
        sq, saq = carry
        q_h = q_ref[0, h]                                                   # [N, D]
        aq_h = jnp.dot(e_ref[0], q_h, preferred_element_type=jnp.float32)   # [A, D]
        aq_buf[h] = aq_h
        sq = sq + jnp.sum(jnp.sum(q_h * q_h, axis=-1, keepdims=True),
                          axis=0, keepdims=True)
        saq = saq + jnp.sum(jnp.sum(aq_h * aq_h, axis=-1, keepdims=True),
                            axis=0, keepdims=True)
        return sq, saq

    zero11 = jnp.zeros((1, 1), jnp.float32)
    ssq_q, ssq_aq = lax.fori_loop(0, heads, proj_body, (zero11, zero11),
                                  unroll=True)
    # EUP rsqrt instead of sqrt + divide (reference's +1e-10 is ~1e-12 relative)
    inv_q = lax.rsqrt(ssq_q)                       # 1/||q||_F          (1, 1)
    inv_scale = inv_q * lax.rsqrt(ssq_aq)          # 1/(||q|| * ||aq||) (1, 1)

    sign = 2.0 * br.astype(jnp.float32) - 1.0      # add: -1, diff: +1
    inv_tau = 1.0 / float(tau)
    k_over_h = float(K) / float(heads)

    # ---- per-head anchor attention (unrolled), attention carried in vregs ---
    def att_body(h, att):
        q_h = q_ref[0, h]                                                   # [N, D]
        aq_h = aq_buf[h]                                                    # [A, D]
        logits = lax.dot_general(q_h, aq_h, _NT,
                                 preferred_element_type=jnp.float32)        # [N, A]
        logits = logits * inv_scale
        # b, c as VPU lane reductions instead of 1-column MXU matmuls
        b = jax.nn.sigmoid(jnp.sum(q_h * wb_ref[0], axis=-1, keepdims=True) * inv_q)
        c = jax.nn.sigmoid(jnp.sum(q_h * wc_ref[0], axis=-1, keepdims=True) * inv_q)
        t = logits + sign * b
        # TODO(synk): pl.reciprocal(approx=True) on these [N,1] divides saves
        # little (they are 1/A of the EUP exp traffic) but its error amplifies
        # ~10x through att@att^T@x; kept exact to hold the reference check.
        row_scale = 1.0 / (-0.1 * c)                                        # [N, 1]
        e = jnp.exp(t * t * row_scale)                                      # (0, 1]
        # e <= 1 and tau > 0 bound e/tau, so no max-subtraction is needed.
        p_un = jnp.exp(e * inv_tau)
        denom = jnp.sum(p_un, axis=-1, keepdims=True)
        return att + p_un * (k_over_h / denom)

    att = lax.fori_loop(0, heads, att_body, jnp.zeros((N, A), jnp.float32),
                        unroll=True)

    # ---- dense anchor(-diff) bipartite graph conv + projections -------------
    xv = x_ref[...]                                                         # [N, Fin]
    # anchor_x = att^T @ x via TN dot_general (no materialized transpose)
    anchor_x = lax.dot_general(att, xv, _TN, preferred_element_type=jnp.float32)
    agg = jnp.dot(att, anchor_x, preferred_element_type=jnp.float32)        # [N, Fin]
    # diff variant: sum_j adj_ij (x_i - x_j) = deg_i*x_i - (adj@x)_i with
    # deg_i = att_i . colsum(att)  (never forms the [N,N] adjacency)
    colsum = jnp.sum(att, axis=0, keepdims=True)                            # [1, A]
    deg = jnp.sum(att * colsum, axis=-1, keepdims=True)                     # [N, 1]
    is_diff = (br == 1).astype(jnp.float32)
    agg = (1.0 - is_diff) * agg + is_diff * (deg * xv - agg)
    # Both projections write the zero-padded, lane-dense (Dp = 128) slab.
    # TODO(synk): fusing them as [N,2*Fin]@[2*Fin,Dp] needs a minor-dim concat
    # of two 32-lane halves (relayout risk); kept as two lane-dense matmuls.
    out = lax.dot_general(agg, wrel_ref[0], _NT, preferred_element_type=jnp.float32)
    out = out + lax.dot_general(xv, wroot_ref[0], _NT,
                                preferred_element_type=jnp.float32)
    o_ref[0] = out + brel_ref[0]


# ----------------------------------------------------------------------------
# Forward: kernel 1 (fused projection) + kernel 2 (grid=(2,), branch-parallel)
# ----------------------------------------------------------------------------
def dual_gumbel_anchor_gcn_forward(x, params, *, heads, out_dim, K, tau):
    # params: dict of branch-stacked arrays (leading dim 2: 0 = add, 1 = diff)
    N, Fin = x.shape
    H, D = heads, out_dim
    A = params["E"].shape[1]
    HD = H * D
    HD2 = 2 * HD
    HD2p = _round_up(HD2, 128)     # lane-dense projection output (=128 here)
    Dp = _round_up(D, 128)         # lane-dense GNN output (sliced back below)

    # --- kernel 1: both-branch projection in one lane-dense matmul ----------
    w_lin_cat = params["W_lin"].reshape(HD2, Fin)          # [2*H*D, Fin]
    if HD2p != HD2:
        w_lin_cat = jnp.pad(w_lin_cat, ((0, HD2p - HD2), (0, 0)))
    q_all = pl.pallas_call(
        _proj_kernel,
        out_shape=jax.ShapeDtypeStruct((N, HD2p), jnp.float32),
    )(x, w_lin_cat)

    # torch's q.reshape(heads, -1, out_dim) per branch: row-major relayout of
    # [N, H*D] -> [H, N, D].  Tiny at these shapes.
    # TODO(synk): at realistic N feed kernel 2 per-head [N/H, H*D] row-blocks of
    # q_all and reshape in VMEM instead (saves the q write+read of HBM).
    q3 = (q_all[:, :HD2].reshape(N, 2, HD)
          .transpose(1, 0, 2).reshape(2, H, N, D))

    # zero-pad the GNN projection weights / bias to a 128-lane output slab
    w_rel = jnp.pad(params["W_rel"], ((0, 0), (0, Dp - D), (0, 0)))
    w_root = jnp.pad(params["W_root"], ((0, 0), (0, Dp - D), (0, 0)))
    b_rel = jnp.pad(params["b_rel"], ((0, 0), (0, 0), (0, Dp - D)))

    # --- kernel 2: fused anchor attention + graph conv, one step per branch --
    kern = functools.partial(_attn_gnn_kernel, heads=H, K=K, tau=tau)
    out_all = pl.pallas_call(
        kern,
        out_shape=jax.ShapeDtypeStruct((2, N, Dp), jnp.float32),
        grid=(2,),
        in_specs=[
            pl.BlockSpec((1, H, N, D), lambda br: (br, 0, 0, 0)),   # q3
            pl.BlockSpec((N, Fin),     lambda br: (0, 0)),          # x
            pl.BlockSpec((1, A, N),    lambda br: (br, 0, 0)),      # E
            pl.BlockSpec((1, 1, D),    lambda br: (br, 0, 0)),      # w_b
            pl.BlockSpec((1, 1, D),    lambda br: (br, 0, 0)),      # w_c
            pl.BlockSpec((1, Dp, Fin), lambda br: (br, 0, 0)),      # W_rel (pad)
            pl.BlockSpec((1, Dp, Fin), lambda br: (br, 0, 0)),      # W_root (pad)
            pl.BlockSpec((1, 1, Dp),   lambda br: (br, 0, 0)),      # b_rel (pad)
        ],
        out_specs=pl.BlockSpec((1, N, Dp), lambda br: (br, 0, 0)),
        scratch_shapes=[pltpu.VMEM((H, A, D), jnp.float32)],        # anchor_q
        compiler_params=pltpu.CompilerParams(
            dimension_semantics=("parallel",)),   # one branch per TC on v7x
    )(q3, x, params["E"], params["w_b"], params["w_c"], w_rel, w_root, b_rel)

    # dual combine: (add + diff) / 2; dense-GNN batch dim of 1; drop lane pad
    out = out_all[:, :, :D]
    return (0.5 * (out[0] + out[1]))[None]


# ----------------------------------------------------------------------------
# Pure-JAX reference (eval mode), same assumed anchor graph conv semantics
# ----------------------------------------------------------------------------
def _ref_branch(x, p, *, sign, diff, heads, out_dim, K, tau):
    q = (x @ p["W_lin"].T).reshape(heads, -1, out_dim)          # torch reshape
    aq = jnp.einsum("an,hnd->had", p["E"], q)                   # anchor_q (raw q)
    qn = q / (jnp.sqrt(jnp.sum(q * q)) + 1e-10)
    aqn = aq / (jnp.sqrt(jnp.sum(aq * aq)) + 1e-10)
    logits = jnp.einsum("hnd,had->hna", qn, aqn)
    b = jax.nn.sigmoid(jnp.einsum("hnd,od->hno", qn, p["w_b"]))
    c = jax.nn.sigmoid(jnp.einsum("hnd,od->hno", qn, p["w_c"]))
    e = jnp.exp((logits + sign * b) ** 2 / (-0.1 * c))
    probs = jax.nn.softmax(e / tau, axis=-1)
    att = K * jnp.mean(probs, axis=0)                           # [N, A]
    agg = att @ (att.T @ x)
    if diff:
        deg = jnp.sum(att * jnp.sum(att, axis=0, keepdims=True),
                      axis=-1, keepdims=True)
        agg = deg * x - agg
    return agg @ p["W_rel"].T + p["b_rel"] + x @ p["W_root"].T


def _ref_dual(x, p_add, p_diff, **kw):
    x1 = _ref_branch(x, p_add, sign=-1.0, diff=False, **kw)
    x2 = _ref_branch(x, p_diff, sign=+1.0, diff=True, **kw)
    return ((x1 + x2) / 2.0)[None]


# ----------------------------------------------------------------------------
# main
# ----------------------------------------------------------------------------
if __name__ == "__main__":
    N, in_dim, out_dim, heads = 16, 32, 16, 4
    anchor_nodes, K, tau = 8, 5, 0.25

    def glorot(key, shape):
        fan_out, fan_in = shape
        lim = (6.0 / (fan_in + fan_out)) ** 0.5
        return jax.random.uniform(key, shape, jnp.float32, -lim, lim)

    def make_params(key):
        ks = jax.random.split(key, 6)
        return {
            "W_lin":  glorot(ks[0], (heads * out_dim, in_dim)),
            "w_b":    glorot(ks[1], (1, out_dim)),
            "w_c":    glorot(ks[2], (1, out_dim)),
            "E":      glorot(ks[3], (anchor_nodes, N)),
            "W_rel":  glorot(ks[4], (out_dim, in_dim)),
            "b_rel":  jnp.zeros((out_dim,), jnp.float32),
            "W_root": glorot(ks[5], (out_dim, in_dim)),
        }

    root = jax.random.PRNGKey(0)
    k_add, k_diff, k_x = jax.random.split(root, 3)
    p_add, p_diff = make_params(k_add), make_params(k_diff)
    x = jax.random.normal(k_x, (N, in_dim), jnp.float32)

    # branch-stack parameters (0 = add / GumbelAnchorGCNConv, 1 = diff variant)
    stacked = {
        "W_lin":  jnp.stack([p_add["W_lin"], p_diff["W_lin"]]),
        "w_b":    jnp.stack([p_add["w_b"], p_diff["w_b"]]),
        "w_c":    jnp.stack([p_add["w_c"], p_diff["w_c"]]),
        "E":      jnp.stack([p_add["E"], p_diff["E"]]),
        "W_rel":  jnp.stack([p_add["W_rel"], p_diff["W_rel"]]),
        "b_rel":  jnp.stack([p_add["b_rel"].reshape(1, out_dim),
                             p_diff["b_rel"].reshape(1, out_dim)]),
        "W_root": jnp.stack([p_add["W_root"], p_diff["W_root"]]),
    }

    fwd = jax.jit(functools.partial(dual_gumbel_anchor_gcn_forward,
                                    heads=heads, out_dim=out_dim, K=K, tau=tau))
    out = jax.block_until_ready(fwd(x, stacked))

    ref = _ref_dual(x, p_add, p_diff, heads=heads, out_dim=out_dim, K=K, tau=tau)
    # 5e-4: rsqrt-based global norms and the max-free softmax reassociate a few
    # ulps vs the torch-exact sqrt/max form; math is otherwise identical.
    np.testing.assert_allclose(np.asarray(out), np.asarray(ref),
                               rtol=5e-4, atol=5e-4)
    assert out.shape == (1, N, out_dim)
    print("KERNEL_OK")
</pallas_src>

<mosaic_0001>
module attributes {stable_mosaic.version = 11 : i64} {
  func.func @_proj_kernel(%arg0: memref<16x32xf32, #tpu.memory_space<vmem>>, %arg1: memref<128x32xf32, #tpu.memory_space<vmem>>, %arg2: memref<16x128xf32, #tpu.memory_space<vmem>>) attributes {dimension_semantics = [], scalar_prefetch = 0 : i64, scratch_operands = 0 : i64, tpu.core_type = #tpu.core_type<tc>} {
    %c0 = arith.constant 0 : index
    %c0_0 = arith.constant 0 : index
    %0 = vector.load %arg0[%c0, %c0_0] : memref<16x32xf32, #tpu.memory_space<vmem>>, vector<16x32xf32>
    %c0_1 = arith.constant 0 : index
    %c0_2 = arith.constant 0 : index
    %1 = vector.load %arg1[%c0_1, %c0_2] : memref<128x32xf32, #tpu.memory_space<vmem>>, vector<128x32xf32>
    %cst = arith.constant dense<0.000000e+00> : vector<16x128xf32>
    %2 = tpu.matmul %0, %1, %cst {dimension_numbers = #tpu.dot_dimension_numbers<[1], [1], [0], [0], [0, 0, 1, 0], [], []>} : vector<16x32xf32>, vector<128x32xf32>, vector<16x128xf32> -> vector<16x128xf32>
    %c0_3 = arith.constant 0 : index
    %c0_4 = arith.constant 0 : index
    %3 = vector.load %arg2[%c0_3, %c0_4] : memref<16x128xf32, #tpu.memory_space<vmem>>, vector<16x128xf32>
    tpu.vector_store %arg2[%c0_3, %c0_4], %2 {strides = array<i32>} : memref<16x128xf32, #tpu.memory_space<vmem>>, vector<16x128xf32>,
    return
  }
}

module attributes {stable_mosaic.version = 11 : i64} {
  func.func @_attn_gnn_kernel(%arg0: i32, %arg1: memref<1x4x16x16xf32, #tpu.memory_space<vmem>>, %arg2: memref<16x32xf32, #tpu.memory_space<vmem>>, %arg3: memref<1x8x16xf32, #tpu.memory_space<vmem>>, %arg4: memref<1x1x16xf32, #tpu.memory_space<vmem>>, %arg5: memref<1x1x16xf32, #tpu.memory_space<vmem>>, %arg6: memref<1x128x32xf32, #tpu.memory_space<vmem>>, %arg7: memref<1x128x32xf32, #tpu.memory_space<vmem>>, %arg8: memref<1x1x128xf32, #tpu.memory_space<vmem>>, %arg9: memref<1x16x128xf32, #tpu.memory_space<vmem>>, %arg10: memref<4x8x16xf32, #tpu.memory_space<vmem>>) attributes {dimension_semantics = [#tpu.dimension_semantics<parallel>], iteration_bounds = array<i64: 2>, scalar_prefetch = 0 : i64, scratch_operands = 1 : i64, tpu.core_type = #tpu.core_type<tc>, window_params = [{transform_indices = @transform_0, window_bounds = array<i64: 1, 4, 16, 16>}, {pipeline_mode = #tpu.pipeline_mode<synchronous>, transform_indices = @transform_1, window_bounds = array<i64: 16, 32>}, {transform_indices = @transform_2, window_bounds = array<i64: 1, 8, 16>}, {transform_indices = @transform_3, window_bounds = array<i64: 1, 1, 16>}, {transform_indices = @transform_4, window_bounds = array<i64: 1, 1, 16>}, {transform_indices = @transform_5, window_bounds = array<i64: 1, 128, 32>}, {transform_indices = @transform_6, window_bounds = array<i64: 1, 128, 32>}, {transform_indices = @transform_7, window_bounds = array<i64: 1, 1, 128>}, {transform_indices = @transform_8, window_bounds = array<i64: 1, 16, 128>}]} {
    %cst = arith.constant 0.000000e+00 : f32
    %0 = vector.broadcast %cst : f32 to vector<1x1xf32>
    %c0_i32 = arith.constant 0 : i32
    %c0 = arith.constant 0 : index
    %1 = arith.index_cast %c0_i32 : i32 to index
    %c0_0 = arith.constant 0 : index
    %c0_1 = arith.constant 0 : index
    %2 = vector.load %arg1[%c0, %1, %c0_0, %c0_1] : memref<1x4x16x16xf32, #tpu.memory_space<vmem>>, vector<1x1x16x16xf32>
    %3 = vector.shape_cast %2 : vector<1x1x16x16xf32> to vector<16x16xf32>
    %c0_2 = arith.constant 0 : index
    %c0_3 = arith.constant 0 : index
    %c0_4 = arith.constant 0 : index
    %4 = vector.load %arg3[%c0_2, %c0_3, %c0_4] : memref<1x8x16xf32, #tpu.memory_space<vmem>>, vector<1x8x16xf32>
    %5 = vector.shape_cast %4 : vector<1x8x16xf32> to vector<8x16xf32>
    %cst_5 = arith.constant dense<0.000000e+00> : vector<8x16xf32>
    %6 = tpu.matmul %5, %3, %cst_5 {dimension_numbers = #tpu.dot_dimension_numbers<[1], [0], [0], [1], [0, 0, 1, 1], [], []>} : vector<8x16xf32>, vector<16x16xf32>, vector<8x16xf32> -> vector<8x16xf32>
    %7 = arith.index_cast %c0_i32 : i32 to index
    %c0_6 = arith.constant 0 : index
    %c0_7 = arith.constant 0 : index
    %8 = vector.load %arg10[%7, %c0_6, %c0_7] : memref<4x8x16xf32, #tpu.memory_space<vmem>>, vector<1x8x16xf32>
    %9 = vector.shape_cast %8 : vector<1x8x16xf32> to vector<8x16xf32>
    %10 = vector.shape_cast %6 : vector<8x16xf32> to vector<1x8x16xf32>
    tpu.vector_store %arg10[%7, %c0_6, %c0_7], %10 {strides = array<i32>} : memref<4x8x16xf32, #tpu.memory_space<vmem>>, vector<1x8x16xf32>,
    %11 = arith.mulf %3, %3 : vector<16x16xf32>
    %cst_8 = arith.constant dense<0.000000e+00> : vector<16xf32>
    %12 = vector.multi_reduction <add>, %11, %cst_8 [1] : vector<16x16xf32> to vector<16xf32>
    %13 = vector.shape_cast %12 : vector<16xf32> to vector<16x1xf32>
    %cst_9 = arith.constant dense<0.000000e+00> : vector<1xf32>
    %14 = vector.multi_reduction <add>, %13, %cst_9 [0] : vector<16x1xf32> to vector<1xf32>
    %15 = vector.shape_cast %14 : vector<1xf32> to vector<1x1xf32>
    %16 = arith.addf %0, %15 : vector<1x1xf32>
    %17 = arith.mulf %6, %6 : vector<8x16xf32>
    %cst_10 = arith.constant dense<0.000000e+00> : vector<8xf32>
    %18 = vector.multi_reduction <add>, %17, %cst_10 [1] : vector<8x16xf32> to vector<8xf32>
    %19 = vector.shape_cast %18 : vector<8xf32> to vector<8x1xf32>
    %cst_11 = arith.constant dense<0.000000e+00> : vector<1xf32>
    %20 = vector.multi_reduction <add>, %19, %cst_11 [0] : vector<8x1xf32> to vector<1xf32>
    %21 = vector.shape_cast %20 : vector<1xf32> to vector<1x1xf32>
    %22 = arith.addf %0, %21 : vector<1x1xf32>
    %c1_i32 = arith.constant 1 : i32
    %c0_12 = arith.constant 0 : index
    %23 = arith.index_cast %c1_i32 : i32 to index
    %c0_13 = arith.constant 0 : index
    %c0_14 = arith.constant 0 : index
    %24 = vector.load %arg1[%c0_12, %23, %c0_13, %c0_14] : memref<1x4x16x16xf32, #tpu.memory_space<vmem>>, vector<1x1x16x16xf32>
    %25 = vector.shape_cast %24 : vector<1x1x16x16xf32> to vector<16x16xf32>
    %c0_15 = arith.constant 0 : index
    %c0_16 = arith.constant 0 : index
    %c0_17 = arith.constant 0 : index
    %26 = vector.load %arg3[%c0_15, %c0_16, %c0_17] : memref<1x8x16xf32, #tpu.memory_space<vmem>>, vector<1x8x16xf32>
    %27 = vector.shape_cast %26 : vector<1x8x16xf32> to vector<8x16xf32>
    %cst_18 = arith.constant dense<0.000000e+00> : vector<8x16xf32>
    %28 = tpu.matmul %27, %25, %cst_18 {dimension_numbers = #tpu.dot_dimension_numbers<[1], [0], [0], [1], [0, 0, 1, 1], [], []>} : vector<8x16xf32>, vector<16x16xf32>, vector<8x16xf32> -> vector<8x16xf32>
    %29 = arith.index_cast %c1_i32 : i32 to index
    %c0_19 = arith.constant 0 : index
    %c0_20 = arith.constant 0 : index
    %30 = vector.load %arg10[%29, %c0_19, %c0_20] : memref<4x8x16xf32, #tpu.memory_space<vmem>>, vector<1x8x16xf32>
    %31 = vector.shape_cast %30 : vector<1x8x16xf32> to vector<8x16xf32>
    %32 = vector.shape_cast %28 : vector<8x16xf32> to vector<1x8x16xf32>
    tpu.vector_store %arg10[%29, %c0_19, %c0_20], %32 {strides = array<i32>} : memref<4x8x16xf32, #tpu.memory_space<vmem>>, vector<1x8x16xf32>,
    %33 = arith.mulf %25, %25 : vector<16x16xf32>
    %cst_21 = arith.constant dense<0.000000e+00> : vector<16xf32>
    %34 = vector.multi_reduction <add>, %33, %cst_21 [1] : vector<16x16xf32> to vector<16xf32>
    %35 = vector.shape_cast %34 : vector<16xf32> to vector<16x1xf32>
    %cst_22 = arith.constant dense<0.000000e+00> : vector<1xf32>
    %36 = vector.multi_reduction <add>, %35, %cst_22 [0] : vector<16x1xf32> to vector<1xf32>
    %37 = vector.shape_cast %36 : vector<1xf32> to vector<1x1xf32>
    %38 = arith.addf %16, %37 : vector<1x1xf32>
    %39 = arith.mulf %28, %28 : vector<8x16xf32>
    %cst_23 = arith.constant dense<0.000000e+00> : vector<8xf32>
    %40 = vector.multi_reduction <add>, %39, %cst_23 [1] : vector<8x16xf32> to vector<8xf32>
    %41 = vector.shape_cast %40 : vector<8xf32> to vector<8x1xf32>
    %cst_24 = arith.constant dense<0.000000e+00> : vector<1xf32>
    %42 = vector.multi_reduction <add>, %41, %cst_24 [0] : vector<8x1xf32> to vector<1xf32>
    %43 = vector.shape_cast %42 : vector<1xf32> to vector<1x1xf32>
    %44 = arith.addf %22, %43 : vector<1x1xf32>
    %c2_i32 = arith.constant 2 : i32
    %c0_25 = arith.constant 0 : index
    %45 = arith.index_cast %c2_i32 : i32 to index
    %c0_26 = arith.constant 0 : index
    %c0_27 = arith.constant 0 : index
    %46 = vector.load %arg1[%c0_25, %45, %c0_26, %c0_27] : memref<1x4x16x16xf32, #tpu.memory_space<vmem>>, vector<1x1x16x16xf32>
    %47 = vector.shape_cast %46 : vector<1x1x16x16xf32> to vector<16x16xf32>
    %c0_28 = arith.constant 0 : index
    %c0_29 = arith.constant 0 : index
    %c0_30 = arith.constant 0 : index
    %48 = vector.load %arg3[%c0_28, %c0_29, %c0_30] : memref<1x8x16xf32, #tpu.memory_space<vmem>>, vector<1x8x16xf32>
    %49 = vector.shape_cast %48 : vector<1x8x16xf32> to vector<8x16xf32>
    %cst_31 = arith.constant dense<0.000000e+00> : vector<8x16xf32>
    %50 = tpu.matmul %49, %47, %cst_31 {dimension_numbers = #tpu.dot_dimension_numbers<[1], [0], [0], [1], [0, 0, 1, 1], [], []>} : vector<8x16xf32>, vector<16x16xf32>, vector<8x16xf32> -> vector<8x16xf32>
    %51 = arith.index_cast %c2_i32 : i32 to index
    %c0_32 = arith.constant 0 : index
    %c0_33 = arith.constant 0 : index
    %52 = vector.load %arg10[%51, %c0_32, %c0_33] : memref<4x8x16xf32, #tpu.memory_space<vmem>>, vector<1x8x16xf32>
    %53 = vector.shape_cast %52 : vector<1x8x16xf32> to vector<8x16xf32>
    %54 = vector.shape_cast %50 : vector<8x16xf32> to vector<1x8x16xf32>
    tpu.vector_store %arg10[%51, %c0_32, %c0_33], %54 {strides = array<i32>} : memref<4x8x16xf32, #tpu.memory_space<vmem>>, vector<1x8x16xf32>,
    %55 = arith.mulf %47, %47 : vector<16x16xf32>
    %cst_34 = arith.constant dense<0.000000e+00> : vector<16xf32>
    %56 = vector.multi_reduction <add>, %55, %cst_34 [1] : vector<16x16xf32> to vector<16xf32>
    %57 = vector.shape_cast %56 : vector<16xf32> to vector<16x1xf32>
    %cst_35 = arith.constant dense<0.000000e+00> : vector<1xf32>
    %58 = vector.multi_reduction <add>, %57, %cst_35 [0] : vector<16x1xf32> to vector<1xf32>
    %59 = vector.shape_cast %58 : vector<1xf32> to vector<1x1xf32>
    %60 = arith.addf %38, %59 : vector<1x1xf32>
    %61 = arith.mulf %50, %50 : vector<8x16xf32>
    %cst_36 = arith.constant dense<0.000000e+00> : vector<8xf32>
    %62 = vector.multi_reduction <add>, %61, %cst_36 [1] : vector<8x16xf32> to vector<8xf32>
    %63 = vector.shape_cast %62 : vector<8xf32> to vector<8x1xf32>
    %cst_37 = arith.constant dense<0.000000e+00> : vector<1xf32>
    %64 = vector.multi_reduction <add>, %63, %cst_37 [0] : vector<8x1xf32> to vector<1xf32>
    %65 = vector.shape_cast %64 : vector<1xf32> to vector<1x1xf32>
    %66 = arith.addf %44, %65 : vector<1x1xf32>
    %c3_i32 = arith.constant 3 : i32
    %c0_38 = arith.constant 0 : index
    %67 = arith.index_cast %c3_i32 : i32 to index
    %c0_39 = arith.constant 0 : index
    %c0_40 = arith.constant 0 : index
    %68 = vector.load %arg1[%c0_38, %67, %c0_39, %c0_40] : memref<1x4x16x16xf32, #tpu.memory_space<vmem>>, vector<1x1x16x16xf32>
    %69 = vector.shape_cast %68 : vector<1x1x16x16xf32> to vector<16x16xf32>
    %c0_41 = arith.constant 0 : index
    %c0_42 = arith.constant 0 : index
    %c0_43 = arith.constant 0 : index
    %70 = vector.load %arg3[%c0_41, %c0_42, %c0_43] : memref<1x8x16xf32, #tpu.memory_space<vmem>>, vector<1x8x16xf32>
    %71 = vector.shape_cast %70 : vector<1x8x16xf32> to vector<8x16xf32>
    %cst_44 = arith.constant dense<0.000000e+00> : vector<8x16xf32>
    %72 = tpu.matmul %71, %69, %cst_44 {dimension_numbers = #tpu.dot_dimension_numbers<[1], [0], [0], [1], [0, 0, 1, 1], [], []>} : vector<8x16xf32>, vector<16x16xf32>, vector<8x16xf32> -> vector<8x16xf32>
    %73 = arith.index_cast %c3_i32 : i32 to index
    %c0_45 = arith.constant 0 : index
    %c0_46 = arith.constant 0 : index
    %74 = vector.load %arg10[%73, %c0_45, %c0_46] : memref<4x8x16xf32, #tpu.memory_space<vmem>>, vector<1x8x16xf32>
    %75 = vector.shape_cast %74 : vector<1x8x16xf32> to vector<8x16xf32>
    %76 = vector.shape_cast %72 : vector<8x16xf32> to vector<1x8x16xf32>
    tpu.vector_store %arg10[%73, %c0_45, %c0_46], %76 {strides = array<i32>} : memref<4x8x16xf32, #tpu.memory_space<vmem>>, vector<1x8x16xf32>,
    %77 = arith.mulf %69, %69 : vector<16x16xf32>
    %cst_47 = arith.constant dense<0.000000e+00> : vector<16xf32>
    %78 = vector.multi_reduction <add>, %77, %cst_47 [1] : vector<16x16xf32> to vector<16xf32>
    %79 = vector.shape_cast %78 : vector<16xf32> to vector<16x1xf32>
    %cst_48 = arith.constant dense<0.000000e+00> : vector<1xf32>
    %80 = vector.multi_reduction <add>, %79, %cst_48 [0] : vector<16x1xf32> to vector<1xf32>
    %81 = vector.shape_cast %80 : vector<1xf32> to vector<1x1xf32>
    %82 = arith.addf %60, %81 : vector<1x1xf32>
    %83 = arith.mulf %72, %72 : vector<8x16xf32>
    %cst_49 = arith.constant dense<0.000000e+00> : vector<8xf32>
    %84 = vector.multi_reduction <add>, %83, %cst_49 [1] : vector<8x16xf32> to vector<8xf32>
    %85 = vector.shape_cast %84 : vector<8xf32> to vector<8x1xf32>
    %cst_50 = arith.constant dense<0.000000e+00> : vector<1xf32>
    %86 = vector.multi_reduction <add>, %85, %cst_50 [0] : vector<8x1xf32> to vector<1xf32>
    %87 = vector.shape_cast %86 : vector<1xf32> to vector<1x1xf32>
    %88 = arith.addf %66, %87 : vector<1x1xf32>
    %c4_i32 = arith.constant 4 : i32
    %89 = math.rsqrt %82 : vector<1x1xf32>
    %90 = math.rsqrt %88 : vector<1x1xf32>
    %91 = arith.mulf %89, %90 : vector<1x1xf32>
    %92 = arith.sitofp %arg0 : i32 to f32
    %cst_51 = arith.constant 2.000000e+00 : f32
    %93 = arith.mulf %cst_51, %92 : f32
    %cst_52 = arith.constant 1.000000e+00 : f32
    %94 = arith.subf %93, %cst_52 : f32
    %cst_53 = arith.constant 0.000000e+00 : f32
    %95 = vector.broadcast %cst_53 : f32 to vector<16x8xf32>
    %c0_i32_54 = arith.constant 0 : i32
    %c0_55 = arith.constant 0 : index
    %96 = arith.index_cast %c0_i32_54 : i32 to index
    %c0_56 = arith.constant 0 : index
    %c0_57 = arith.constant 0 : index
    %97 = vector.load %arg1[%c0_55, %96, %c0_56, %c0_57] : memref<1x4x16x16xf32, #tpu.memory_space<vmem>>, vector<1x1x16x16xf32>
    %98 = vector.shape_cast %97 : vector<1x1x16x16xf32> to vector<16x16xf32>
    %99 = arith.index_cast %c0_i32_54 : i32 to index
    %c0_58 = arith.constant 0 : index
    %c0_59 = arith.constant 0 : index
    %100 = vector.load %arg10[%99, %c0_58, %c0_59] : memref<4x8x16xf32, #tpu.memory_space<vmem>>, vector<1x8x16xf32>
    %101 = vector.shape_cast %100 : vector<1x8x16xf32> to vector<8x16xf32>
    %cst_60 = arith.constant dense<0.000000e+00> : vector<16x8xf32>
    %102 = tpu.matmul %98, %101, %cst_60 {dimension_numbers = #tpu.dot_dimension_numbers<[1], [1], [0], [0], [0, 0, 1, 0], [], []>} : vector<16x16xf32>, vector<8x16xf32>, vector<16x8xf32> -> vector<16x8xf32>
    %103 = vector.broadcast %91 : vector<1x1xf32> to vector<16x8xf32>
    %104 = arith.mulf %102, %103 : vector<16x8xf32>
    %c0_61 = arith.constant 0 : index
    %c0_62 = arith.constant 0 : index
    %c0_63 = arith.constant 0 : index
    %105 = vector.load %arg4[%c0_61, %c0_62, %c0_63] : memref<1x1x16xf32, #tpu.memory_space<vmem>>, vector<1x1x16xf32>
    %106 = vector.shape_cast %105 : vector<1x1x16xf32> to vector<1x16xf32>
    %107 = vector.broadcast %106 : vector<1x16xf32> to vector<16x16xf32>
    %108 = arith.mulf %98, %107 : vector<16x16xf32>
    %cst_64 = arith.constant dense<0.000000e+00> : vector<16xf32>
    %109 = vector.multi_reduction <add>, %108, %cst_64 [1] : vector<16x16xf32> to vector<16xf32>
    %110 = vector.shape_cast %109 : vector<16xf32> to vector<16x1xf32>
    %111 = vector.broadcast %89 : vector<1x1xf32> to vector<16x1xf32>
    %112 = arith.mulf %110, %111 : vector<16x1xf32>
    %113 = arith.negf %112 : vector<16x1xf32>
    %114 = math.exp %113 : vector<16x1xf32>
    %cst_65 = arith.constant 1.000000e+00 : f32
    %115 = vector.broadcast %cst_65 : f32 to vector<16x1xf32>
    %116 = arith.addf %115, %114 : vector<16x1xf32>
    %117 = arith.divf %115, %116 : vector<16x1xf32>
    %c0_66 = arith.constant 0 : index
    %c0_67 = arith.constant 0 : index
    %c0_68 = arith.constant 0 : index
    %118 = vector.load %arg5[%c0_66, %c0_67, %c0_68] : memref<1x1x16xf32, #tpu.memory_space<vmem>>, vector<1x1x16xf32>
    %119 = vector.shape_cast %118 : vector<1x1x16xf32> to vector<1x16xf32>
    %120 = vector.broadcast %119 : vector<1x16xf32> to vector<16x16xf32>
    %121 = arith.mulf %98, %120 : vector<16x16xf32>
    %cst_69 = arith.constant dense<0.000000e+00> : vector<16xf32>
    %122 = vector.multi_reduction <add>, %121, %cst_69 [1] : vector<16x16xf32> to vector<16xf32>
    %123 = vector.shape_cast %122 : vector<16xf32> to vector<16x1xf32>
    %124 = vector.broadcast %89 : vector<1x1xf32> to vector<16x1xf32>
    %125 = arith.mulf %123, %124 : vector<16x1xf32>
    %126 = arith.negf %125 : vector<16x1xf32>
    %127 = math.exp %126 : vector<16x1xf32>
    %cst_70 = arith.constant 1.000000e+00 : f32
    %128 = vector.broadcast %cst_70 : f32 to vector<16x1xf32>
    %129 = arith.addf %128, %127 : vector<16x1xf32>
    %130 = arith.divf %128, %129 : vector<16x1xf32>
    %131 = vector.broadcast %94 : f32 to vector<16x1xf32>
    %132 = arith.mulf %131, %117 : vector<16x1xf32>
    %133 = vector.broadcast %132 : vector<16x1xf32> to vector<16x8xf32>
    %134 = arith.addf %104, %133 : vector<16x8xf32>
    %cst_71 = arith.constant -1.000000e-01 : f32
    %135 = vector.broadcast %cst_71 : f32 to vector<16x1xf32>
    %136 = arith.mulf %135, %130 : vector<16x1xf32>
    %cst_72 = arith.constant 1.000000e+00 : f32
    %137 = vector.broadcast %cst_72 : f32 to vector<16x1xf32>
    %138 = arith.divf %137, %136 : vector<16x1xf32>
    %139 = arith.mulf %134, %134 : vector<16x8xf32>
    %140 = vector.broadcast %138 : vector<16x1xf32> to vector<16x8xf32>
    %141 = arith.mulf %139, %140 : vector<16x8xf32>
    %142 = math.exp %141 : vector<16x8xf32>
    %cst_73 = arith.constant 4.000000e+00 : f32
    %143 = vector.broadcast %cst_73 : f32 to vector<16x8xf32>
    %144 = arith.mulf %142, %143 : vector<16x8xf32>
    %145 = math.exp %144 : vector<16x8xf32>
    %cst_74 = arith.constant dense<0.000000e+00> : vector<16xf32>
    %146 = vector.multi_reduction <add>, %145, %cst_74 [1] : vector<16x8xf32> to vector<16xf32>
    %147 = vector.shape_cast %146 : vector<16xf32> to vector<16x1xf32>
    %cst_75 = arith.constant 1.250000e+00 : f32
    %148 = vector.broadcast %cst_75 : f32 to vector<16x1xf32>
    %149 = arith.divf %148, %147 : vector<16x1xf32>
    %150 = vector.broadcast %149 : vector<16x1xf32> to vector<16x8xf32>
    %151 = arith.mulf %145, %150 : vector<16x8xf32>
    %152 = arith.addf %95, %151 : vector<16x8xf32>
    %c1_i32_76 = arith.constant 1 : i32
    %c0_77 = arith.constant 0 : index
    %153 = arith.index_cast %c1_i32_76 : i32 to index
    %c0_78 = arith.constant 0 : index
    %c0_79 = arith.constant 0 : index
    %154 = vector.load %arg1[%c0_77, %153, %c0_78, %c0_79] : memref<1x4x16x16xf32, #tpu.memory_space<vmem>>, vector<1x1x16x16xf32>
    %155 = vector.shape_cast %154 : vector<1x1x16x16xf32> to vector<16x16xf32>
    %156 = arith.index_cast %c1_i32_76 : i32 to index
    %c0_80 = arith.constant 0 : index
    %c0_81 = arith.constant 0 : index
    %157 = vector.load %arg10[%156, %c0_80, %c0_81] : memref<4x8x16xf32, #tpu.memory_space<vmem>>, vector<1x8x16xf32>
    %158 = vector.shape_cast %157 : vector<1x8x16xf32> to vector<8x16xf32>
    %cst_82 = arith.constant dense<0.000000e+00> : vector<16x8xf32>
    %159 = tpu.matmul %155, %158, %cst_82 {dimension_numbers = #tpu.dot_dimension_numbers<[1], [1], [0], [0], [0, 0, 1, 0], [], []>} : vector<16x16xf32>, vector<8x16xf32>, vector<16x8xf32> -> vector<16x8xf32>
    %160 = vector.broadcast %91 : vector<1x1xf32> to vector<16x8xf32>
    %161 = arith.mulf %159, %160 : vector<16x8xf32>
    %c0_83 = arith.constant 0 : index
    %c0_84 = arith.constant 0 : index
    %c0_85 = arith.constant 0 : index
    %162 = vector.load %arg4[%c0_83, %c0_84, %c0_85] : memref<1x1x16xf32, #tpu.memory_space<vmem>>, vector<1x1x16xf32>
    %163 = vector.shape_cast %162 : vector<1x1x16xf32> to vector<1x16xf32>
    %164 = vector.broadcast %163 : vector<1x16xf32> to vector<16x16xf32>
    %165 = arith.mulf %155, %164 : vector<16x16xf32>
    %cst_86 = arith.constant dense<0.000000e+00> : vector<16xf32>
    %166 = vector.multi_reduction <add>, %165, %cst_86 [1] : vector<16x16xf32> to vector<16xf32>
    %167 = vector.shape_cast %166 : vector<16xf32> to vector<16x1xf32>
    %168 = vector.broadcast %89 : vector<1x1xf32> to vector<16x1xf32>
    %169 = arith.mulf %167, %168 : vector<16x1xf32>
    %170 = arith.negf %169 : vector<16x1xf32>
    %171 = math.exp %170 : vector<16x1xf32>
    %cst_87 = arith.constant 1.000000e+00 : f32
    %172 = vector.broadcast %cst_87 : f32 to vector<16x1xf32>
    %173 = arith.addf %172, %171 : vector<16x1xf32>
    %174 = arith.divf %172, %173 : vector<16x1xf32>
    %c0_88 = arith.constant 0 : index
    %c0_89 = arith.constant 0 : index
    %c0_90 = arith.constant 0 : index
    %175 = vector.load %arg5[%c0_88, %c0_89, %c0_90] : memref<1x1x16xf32, #tpu.memory_space<vmem>>, vector<1x1x16xf32>
    %176 = vector.shape_cast %175 : vector<1x1x16xf32> to vector<1x16xf32>
    %177 = vector.broadcast %176 : vector<1x16xf32> to vector<16x16xf32>
    %178 = arith.mulf %155, %177 : vector<16x16xf32>
    %cst_91 = arith.constant dense<0.000000e+00> : vector<16xf32>
    %179 = vector.multi_reduction <add>, %178, %cst_91 [1] : vector<16x16xf32> to vector<16xf32>
    %180 = vector.shape_cast %179 : vector<16xf32> to vector<16x1xf32>
    %181 = vector.broadcast %89 : vector<1x1xf32> to vector<16x1xf32>
    %182 = arith.mulf %180, %181 : vector<16x1xf32>
    %183 = arith.negf %182 : vector<16x1xf32>
    %184 = math.exp %183 : vector<16x1xf32>
    %cst_92 = arith.constant 1.000000e+00 : f32
    %185 = vector.broadcast %cst_92 : f32 to vector<16x1xf32>
    %186 = arith.addf %185, %184 : vector<16x1xf32>
    %187 = arith.divf %185, %186 : vector<16x1xf32>
    %188 = vector.broadcast %94 : f32 to vector<16x1xf32>
    %189 = arith.mulf %188, %174 : vector<16x1xf32>
    %190 = vector.broadcast %189 : vector<16x1xf32> to vector<16x8xf32>
    %191 = arith.addf %161, %190 : vector<16x8xf32>
    %cst_93 = arith.constant -1.000000e-01 : f32
    %192 = vector.broadcast %cst_93 : f32 to vector<16x1xf32>
    %193 = arith.mulf %192, %187 : vector<16x1xf32>
    %cst_94 = arith.constant 1.000000e+00 : f32
    %194 = vector.broadcast %cst_94 : f32 to vector<16x1xf32>
    %195 = arith.divf %194, %193 : vector<16x1xf32>
    %196 = arith.mulf %191, %191 : vector<16x8xf32>
    %197 = vector.broadcast %195 : vector<16x1xf32> to vector<16x8xf32>
    %198 = arith.mulf %196, %197 : vector<16x8xf32>
    %199 = math.exp %198 : vector<16x8xf32>
    %cst_95 = arith.constant 4.000000e+00 : f32
    %200 = vector.broadcast %cst_95 : f32 to vector<16x8xf32>
    %201 = arith.mulf %199, %200 : vector<16x8xf32>
    %202 = math.exp %201 : vector<16x8xf32>
    %cst_96 = arith.constant dense<0.000000e+00> : vector<16xf32>
    %203 = vector.multi_reduction <add>, %202, %cst_96 [1] : vector<16x8xf32> to vector<16xf32>
    %204 = vector.shape_cast %203 : vector<16xf32> to vector<16x1xf32>
    %cst_97 = arith.constant 1.250000e+00 : f32
    %205 = vector.broadcast %cst_97 : f32 to vector<16x1xf32>
    %206 = arith.divf %205, %204 : vector<16x1xf32>
    %207 = vector.broadcast %206 : vector<16x1xf32> to vector<16x8xf32>
    %208 = arith.mulf %202, %207 : vector<16x8xf32>
    %209 = arith.addf %152, %208 : vector<16x8xf32>
    %c2_i32_98 = arith.constant 2 : i32
    %c0_99 = arith.constant 0 : index
    %210 = arith.index_cast %c2_i32_98 : i32 to index
    %c0_100 = arith.constant 0 : index
    %c0_101 = arith.constant 0 : index
    %211 = vector.load %arg1[%c0_99, %210, %c0_100, %c0_101] : memref<1x4x16x16xf32, #tpu.memory_space<vmem>>, vector<1x1x16x16xf32>
    %212 = vector.shape_cast %211 : vector<1x1x16x16xf32> to vector<16x16xf32>
    %213 = arith.index_cast %c2_i32_98 : i32 to index
    %c0_102 = arith.constant 0 : index
    %c0_103 = arith.constant 0 : index
    %214 = vector.load %arg10[%213, %c0_102, %c0_103] : memref<4x8x16xf32, #tpu.memory_space<vmem>>, vector<1x8x16xf32>
    %215 = vector.shape_cast %214 : vector<1x8x16xf32> to vector<8x16xf32>
    %cst_104 = arith.constant dense<0.000000e+00> : vector<16x8xf32>
    %216 = tpu.matmul %212, %215, %cst_104 {dimension_numbers = #tpu.dot_dimension_numbers<[1], [1], [0], [0], [0, 0, 1, 0], [], []>} : vector<16x16xf32>, vector<8x16xf32>, vector<16x8xf32> -> vector<16x8xf32>
    %217 = vector.broadcast %91 : vector<1x1xf32> to vector<16x8xf32>
    %218 = arith.mulf %216, %217 : vector<16x8xf32>
    %c0_105 = arith.constant 0 : index
    %c0_106 = arith.constant 0 : index
    %c0_107 = arith.constant 0 : index
    %219 = vector.load %arg4[%c0_105, %c0_106, %c0_107] : memref<1x1x16xf32, #tpu.memory_space<vmem>>, vector<1x1x16xf32>
    %220 = vector.shape_cast %219 : vector<1x1x16xf32> to vector<1x16xf32>
    %221 = vector.broadcast %220 : vector<1x16xf32> to vector<16x16xf32>
    %222 = arith.mulf %212, %221 : vector<16x16xf32>
    %cst_108 = arith.constant dense<0.000000e+00> : vector<16xf32>
    %223 = vector.multi_reduction <add>, %222, %cst_108 [1] : vector<16x16xf32> to vector<16xf32>
    %224 = vector.shape_cast %223 : vector<16xf32> to vector<16x1xf32>
    %225 = vector.broadcast %89 : vector<1x1xf32> to vector<16x1xf32>
    %226 = arith.mulf %224, %225 : vector<16x1xf32>
    %227 = arith.negf %226 : vector<16x1xf32>
    %228 = math.exp %227 : vector<16x1xf32>
    %cst_109 = arith.constant 1.000000e+00 : f32
    %229 = vector.broadcast %cst_109 : f32 to vector<16x1xf32>
    %230 = arith.addf %229, %228 : vector<16x1xf32>
    %231 = arith.divf %229, %230 : vector<16x1xf32>
    %c0_110 = arith.constant 0 : index
    %c0_111 = arith.constant 0 : index
    %c0_112 = arith.constant 0 : index
    %232 = vector.load %arg5[%c0_110, %c0_111, %c0_112] : memref<1x1x16xf32, #tpu.memory_space<vmem>>, vector<1x1x16xf32>
    %233 = vector.shape_cast %232 : vector<1x1x16xf32> to vector<1x16xf32>
    %234 = vector.broadcast %233 : vector<1x16xf32> to vector<16x16xf32>
    %235 = arith.mulf %212, %234 : vector<16x16xf32>
    %cst_113 = arith.constant dense<0.000000e+00> : vector<16xf32>
    %236 = vector.multi_reduction <add>, %235, %cst_113 [1] : vector<16x16xf32> to vector<16xf32>
    %237 = vector.shape_cast %236 : vector<16xf32> to vector<16x1xf32>
    %238 = vector.broadcast %89 : vector<1x1xf32> to vector<16x1xf32>
    %239 = arith.mulf %237, %238 : vector<16x1xf32>
    %240 = arith.negf %239 : vector<16x1xf32>
    %241 = math.exp %240 : vector<16x1xf32>
    %cst_114 = arith.constant 1.000000e+00 : f32
    %242 = vector.broadcast %cst_114 : f32 to vector<16x1xf32>
    %243 = arith.addf %242, %241 : vector<16x1xf32>
    %244 = arith.divf %242, %243 : vector<16x1xf32>
    %245 = vector.broadcast %94 : f32 to vector<16x1xf32>
    %246 = arith.mulf %245, %231 : vector<16x1xf32>
    %247 = vector.broadcast %246 : vector<16x1xf32> to vector<16x8xf32>
    %248 = arith.addf %218, %247 : vector<16x8xf32>
    %cst_115 = arith.constant -1.000000e-01 : f32
    %249 = vector.broadcast %cst_115 : f32 to vector<16x1xf32>
    %250 = arith.mulf %249, %244 : vector<16x1xf32>
    %cst_116 = arith.constant 1.000000e+00 : f32
    %251 = vector.broadcast %cst_116 : f32 to vector<16x1xf32>
    %252 = arith.divf %251, %250 : vector<16x1xf32>
    %253 = arith.mulf %248, %248 : vector<16x8xf32>
    %254 = vector.broadcast %252 : vector<16x1xf32> to vector<16x8xf32>
    %255 = arith.mulf %253, %254 : vector<16x8xf32>
    %256 = math.exp %255 : vector<16x8xf32>
    %cst_117 = arith.constant 4.000000e+00 : f32
    %257 = vector.broadcast %cst_117 : f32 to vector<16x8xf32>
    %258 = arith.mulf %256, %257 : vector<16x8xf32>
    %259 = math.exp %258 : vector<16x8xf32>
    %cst_118 = arith.constant dense<0.000000e+00> : vector<16xf32>
    %260 = vector.multi_reduction <add>, %259, %cst_118 [1] : vector<16x8xf32> to vector<16xf32>
    %261 = vector.shape_cast %260 : vector<16xf32> to vector<16x1xf32>
    %cst_119 = arith.constant 1.250000e+00 : f32
    %262 = vector.broadcast %cst_119 : f32 to vector<16x1xf32>
    %263 = arith.divf %262, %261 : vector<16x1xf32>
    %264 = vector.broadcast %263 : vector<16x1xf32> to vector<16x8xf32>
    %265 = arith.mulf %259, %264 : vector<16x8xf32>
    %266 = arith.addf %209, %265 : vector<16x8xf32>
    %c3_i32_120 = arith.constant 3 : i32
    %c0_121 = arith.constant 0 : index
    %267 = arith.index_cast %c3_i32_120 : i32 to index
    %c0_122 = arith.constant 0 : index
    %c0_123 = arith.constant 0 : index
    %268 = vector.load %arg1[%c0_121, %267, %c0_122, %c0_123] : memref<1x4x16x16xf32, #tpu.memory_space<vmem>>, vector<1x1x16x16xf32>
    %269 = vector.shape_cast %268 : vector<1x1x16x16xf32> to vector<16x16xf32>
    %270 = arith.index_cast %c3_i32_120 : i32 to index
    %c0_124 = arith.constant 0 : index
    %c0_125 = arith.constant 0 : index
    %271 = vector.load %arg10[%270, %c0_124, %c0_125] : memref<4x8x16xf32, #tpu.memory_space<vmem>>, vector<1x8x16xf32>
    %272 = vector.shape_cast %271 : vector<1x8x16xf32> to vector<8x16xf32>
    %cst_126 = arith.constant dense<0.000000e+00> : vector<16x8xf32>
    %273 = tpu.matmul %269, %272, %cst_126 {dimension_numbers = #tpu.dot_dimension_numbers<[1], [1], [0], [0], [0, 0, 1, 0], [], []>} : vector<16x16xf32>, vector<8x16xf32>, vector<16x8xf32> -> vector<16x8xf32>
    %274 = vector.broadcast %91 : vector<1x1xf32> to vector<16x8xf32>
    %275 = arith.mulf %273, %274 : vector<16x8xf32>
    %c0_127 = arith.constant 0 : index
    %c0_128 = arith.constant 0 : index
    %c0_129 = arith.constant 0 : index
    %276 = vector.load %arg4[%c0_127, %c0_128, %c0_129] : memref<1x1x16xf32, #tpu.memory_space<vmem>>, vector<1x1x16xf32>
    %277 = vector.shape_cast %276 : vector<1x1x16xf32> to vector<1x16xf32>
    %278 = vector.broadcast %277 : vector<1x16xf32> to vector<16x16xf32>
    %279 = arith.mulf %269, %278 : vector<16x16xf32>
    %cst_130 = arith.constant dense<0.000000e+00> : vector<16xf32>
    %280 = vector.multi_reduction <add>, %279, %cst_130 [1] : vector<16x16xf32> to vector<16xf32>
    %281 = vector.shape_cast %280 : vector<16xf32> to vector<16x1xf32>
    %282 = vector.broadcast %89 : vector<1x1xf32> to vector<16x1xf32>
    %283 = arith.mulf %281, %282 : vector<16x1xf32>
    %284 = arith.negf %283 : vector<16x1xf32>
    %285 = math.exp %284 : vector<16x1xf32>
    %cst_131 = arith.constant 1.000000e+00 : f32
    %286 = vector.broadcast %cst_131 : f32 to vector<16x1xf32>
    %287 = arith.addf %286, %285 : vector<16x1xf32>
    %288 = arith.divf %286, %287 : vector<16x1xf32>
    %c0_132 = arith.constant 0 : index
    %c0_133 = arith.constant 0 : index
    %c0_134 = arith.constant 0 : index
    %289 = vector.load %arg5[%c0_132, %c0_133, %c0_134] : memref<1x1x16xf32, #tpu.memory_space<vmem>>, vector<1x1x16xf32>
    %290 = vector.shape_cast %289 : vector<1x1x16xf32> to vector<1x16xf32>
    %291 = vector.broadcast %290 : vector<1x16xf32> to vector<16x16xf32>
    %292 = arith.mulf %269, %291 : vector<16x16xf32>
    %cst_135 = arith.constant dense<0.000000e+00> : vector<16xf32>
    %293 = vector.multi_reduction <add>, %292, %cst_135 [1] : vector<16x16xf32> to vector<16xf32>
    %294 = vector.shape_cast %293 : vector<16xf32> to vector<16x1xf32>
    %295 = vector.broadcast %89 : vector<1x1xf32> to vector<16x1xf32>
    %296 = arith.mulf %294, %295 : vector<16x1xf32>
    %297 = arith.negf %296 : vector<16x1xf32>
    %298 = math.exp %297 : vector<16x1xf32>
    %cst_136 = arith.constant 1.000000e+00 : f32
    %299 = vector.broadcast %cst_136 : f32 to vector<16x1xf32>
    %300 = arith.addf %299, %298 : vector<16x1xf32>
    %301 = arith.divf %299, %300 : vector<16x1xf32>
    %302 = vector.broadcast %94 : f32 to vector<16x1xf32>
    %303 = arith.mulf %302, %288 : vector<16x1xf32>
    %304 = vector.broadcast %303 : vector<16x1xf32> to vector<16x8xf32>
    %305 = arith.addf %275, %304 : vector<16x8xf32>
    %cst_137 = arith.constant -1.000000e-01 : f32
    %306 = vector.broadcast %cst_137 : f32 to vector<16x1xf32>
    %307 = arith.mulf %306, %301 : vector<16x1xf32>
    %cst_138 = arith.constant 1.000000e+00 : f32
    %308 = vector.broadcast %cst_138 : f32 to vector<16x1xf32>
    %309 = arith.divf %308, %307 : vector<16x1xf32>
    %310 = arith.mulf %305, %305 : vector<16x8xf32>
    %311 = vector.broadcast %309 : vector<16x1xf32> to vector<16x8xf32>
    %312 = arith.mulf %310, %311 : vector<16x8xf32>
    %313 = math.exp %312 : vector<16x8xf32>
    %cst_139 = arith.constant 4.000000e+00 : f32
    %314 = vector.broadcast %cst_139 : f32 to vector<16x8xf32>
    %315 = arith.mulf %313, %314 : vector<16x8xf32>
    %316 = math.exp %315 : vector<16x8xf32>
    %cst_140 = arith.constant dense<0.000000e+00> : vector<16xf32>
    %317 = vector.multi_reduction <add>, %316, %cst_140 [1] : vector<16x8xf32> to vector<16xf32>
    %318 = vector.shape_cast %317 : vector<16xf32> to vector<16x1xf32>
    %cst_141 = arith.constant 1.250000e+00 : f32
    %319 = vector.broadcast %cst_141 : f32 to vector<16x1xf32>
    %320 = arith.divf %319, %318 : vector<16x1xf32>
    %321 = vector.broadcast %320 : vector<16x1xf32> to vector<16x8xf32>
    %322 = arith.mulf %316, %321 : vector<16x8xf32>
    %323 = arith.addf %266, %322 : vector<16x8xf32>
    %c4_i32_142 = arith.constant 4 : i32
    %c0_143 = arith.constant 0 : index
    %c0_144 = arith.constant 0 : index
    %324 = vector.load %arg2[%c0_143, %c0_144] : memref<16x32xf32, #tpu.memory_space<vmem>>, vector<16x32xf32>
    %cst_145 = arith.constant dense<0.000000e+00> : vector<8x32xf32>
    %325 = tpu.matmul %323, %324, %cst_145 {dimension_numbers = #tpu.dot_dimension_numbers<[0], [0], [1], [1], [0, 1, 1, 1], [], []>} : vector<16x8xf32>, vector<16x32xf32>, vector<8x32xf32> -> vector<8x32xf32>
    %cst_146 = arith.constant dense<0.000000e+00> : vector<16x32xf32>
    %326 = tpu.matmul %323, %325, %cst_146 {dimension_numbers = #tpu.dot_dimension_numbers<[1], [0], [0], [1], [0, 0, 1, 1], [], []>} : vector<16x8xf32>, vector<8x32xf32>, vector<16x32xf32> -> vector<16x32xf32>
    %cst_147 = arith.constant dense<0.000000e+00> : vector<8xf32>
    %327 = vector.multi_reduction <add>, %323, %cst_147 [0] : vector<16x8xf32> to vector<8xf32>
    %328 = vector.shape_cast %327 : vector<8xf32> to vector<1x8xf32>
    %329 = vector.broadcast %328 : vector<1x8xf32> to vector<16x8xf32>
    %330 = arith.mulf %323, %329 : vector<16x8xf32>
    %cst_148 = arith.constant dense<0.000000e+00> : vector<16xf32>
    %331 = vector.multi_reduction <add>, %330, %cst_148 [1] : vector<16x8xf32> to vector<16xf32>
    %332 = vector.shape_cast %331 : vector<16xf32> to vector<16x1xf32>
    %c1_i32_149 = arith.constant 1 : i32
    %333 = arith.cmpi eq, %arg0, %c1_i32_149 : i32
    %334 = arith.extui %333 : i1 to i32
    %335 = arith.sitofp %334 : i32 to f32
    %cst_150 = arith.constant 1.000000e+00 : f32
    %336 = arith.subf %cst_150, %335 : f32
    %337 = vector.broadcast %336 : f32 to vector<16x32xf32>
    %338 = arith.mulf %337, %326 : vector<16x32xf32>
    %339 = vector.broadcast %332 : vector<16x1xf32> to vector<16x32xf32>
    %340 = arith.mulf %339, %324 : vector<16x32xf32>
    %341 = arith.subf %340, %326 : vector<16x32xf32>
    %342 = vector.broadcast %335 : f32 to vector<16x32xf32>
    %343 = arith.mulf %342, %341 : vector<16x32xf32>
    %344 = arith.addf %338, %343 : vector<16x32xf32>
    %c0_151 = arith.constant 0 : index
    %c0_152 = arith.constant 0 : index
    %c0_153 = arith.constant 0 : index
    %345 = vector.load %arg6[%c0_151, %c0_152, %c0_153] : memref<1x128x32xf32, #tpu.memory_space<vmem>>, vector<1x128x32xf32>
    %346 = vector.shape_cast %345 : vector<1x128x32xf32> to vector<128x32xf32>
    %cst_154 = arith.constant dense<0.000000e+00> : vector<16x128xf32>
    %347 = tpu.matmul %344, %346, %cst_154 {dimension_numbers = #tpu.dot_dimension_numbers<[1], [1], [0], [0], [0, 0, 1, 0], [], []>} : vector<16x32xf32>, vector<128x32xf32>, vector<16x128xf32> -> vector<16x128xf32>
    %c0_155 = arith.constant 0 : index
    %c0_156 = arith.constant 0 : index
    %c0_157 = arith.constant 0 : index
    %348 = vector.load %arg7[%c0_155, %c0_156, %c0_157] : memref<1x128x32xf32, #tpu.memory_space<vmem>>, vector<1x128x32xf32>
    %349 = vector.shape_cast %348 : vector<1x128x32xf32> to vector<128x32xf32>
    %cst_158 = arith.constant dense<0.000000e+00> : vector<16x128xf32>
    %350 = tpu.matmul %324, %349, %cst_158 {dimension_numbers = #tpu.dot_dimension_numbers<[1], [1], [0], [0], [0, 0, 1, 0], [], []>} : vector<16x32xf32>, vector<128x32xf32>, vector<16x128xf32> -> vector<16x128xf32>
    %351 = arith.addf %347, %350 : vector<16x128xf32>
    %c0_159 = arith.constant 0 : index
    %c0_160 = arith.constant 0 : index
    %c0_161 = arith.constant 0 : index
    %352 = vector.load %arg8[%c0_159, %c0_160, %c0_161] : memref<1x1x128xf32, #tpu.memory_space<vmem>>, vector<1x1x128xf32>
    %353 = vector.shape_cast %352 : vector<1x1x128xf32> to vector<1x128xf32>
    %354 = vector.broadcast %353 : vector<1x128xf32> to vector<16x128xf32>
    %355 = arith.addf %351, %354 : vector<16x128xf32>
    %c0_162 = arith.constant 0 : index
    %c0_163 = arith.constant 0 : index
    %c0_164 = arith.constant 0 : index
    %356 = vector.load %arg9[%c0_162, %c0_163, %c0_164] : memref<1x16x128xf32, #tpu.memory_space<vmem>>, vector<1x16x128xf32>
    %357 = vector.shape_cast %356 : vector<1x16x128xf32> to vector<16x128xf32>
    %358 = vector.shape_cast %355 : vector<16x128xf32> to vector<1x16x128xf32>
    tpu.vector_store %arg9[%c0_162, %c0_163, %c0_164], %358 {strides = array<i32>} : memref<1x16x128xf32, #tpu.memory_space<vmem>>, vector<1x16x128xf32>,
    return
  }
  func.func @transform_0(%arg0: i32) -> (i32, i32, i32, i32) {
    %c0_i32 = arith.constant 0 : i32
    %c0_i32_0 = arith.constant 0 : i32
    %c0_i32_1 = arith.constant 0 : i32
    %c0_i32_2 = arith.constant 0 : i32
    return %arg0, %c0_i32, %c0_i32_0, %c0_i32_1 : i32, i32, i32, i32
  }
  func.func @transform_1(%arg0: i32) -> (i32, i32) {
    %c0_i32 = arith.constant 0 : i32
    %c0_i32_0 = arith.constant 0 : i32
    %c0_i32_1 = arith.constant 0 : i32
    return %c0_i32, %c0_i32_0 : i32, i32
  }
  func.func @transform_2(%arg0: i32) -> (i32, i32, i32) {
    %c0_i32 = arith.constant 0 : i32
    %c0_i32_0 = arith.constant 0 : i32
    %c0_i32_1 = arith.constant 0 : i32
    return %arg0, %c0_i32, %c0_i32_0 : i32, i32, i32
  }
  func.func @transform_3(%arg0: i32) -> (i32, i32, i32) {
    %c0_i32 = arith.constant 0 : i32
    %c0_i32_0 = arith.constant 0 : i32
    %c0_i32_1 = arith.constant 0 : i32
    return %arg0, %c0_i32, %c0_i32_0 : i32, i32, i32
  }
  func.func @transform_4(%arg0: i32) -> (i32, i32, i32) {
    %c0_i32 = arith.constant 0 : i32
    %c0_i32_0 = arith.constant 0 : i32
    %c0_i32_1 = arith.constant 0 : i32
    return %arg0, %c0_i32, %c0_i32_0 : i32, i32, i32
  }
  func.func @transform_5(%arg0: i32) -> (i32, i32, i32) {
    %c0_i32 = arith.constant 0 : i32
    %c0_i32_0 = arith.constant 0 : i32
    %c0_i32_1 = arith.constant 0 : i32
    return %arg0, %c0_i32, %c0_i32_0 : i32, i32, i32
  }
  func.func @transform_6(%arg0: i32) -> (i32, i32, i32) {
    %c0_i32 = arith.constant 0 : i32
    %c0_i32_0 = arith.constant 0 : i32
    %c0_i32_1 = arith.constant 0 : i32
    return %arg0, %c0_i32, %c0_i32_0 : i32, i32, i32
  }
  func.func @transform_7(%arg0: i32) -> (i32, i32, i32) {
    %c0_i32 = arith.constant 0 : i32
    %c0_i32_0 = arith.constant 0 : i32
    %c0_i32_1 = arith.constant 0 : i32
    return %arg0, %c0_i32, %c0_i32_0 : i32, i32, i32
  }
  func.func @transform_8(%arg0: i32) -> (i32, i32, i32) {
    %c0_i32 = arith.constant 0 : i32
    %c0_i32_0 = arith.constant 0 : i32
    %c0_i32_1 = arith.constant 0 : i32
    return %arg0, %c0_i32, %c0_i32_0 : i32, i32, i32
  }
}

</mosaic_0001>

<bundles_post_ra>
// kernel: dual_gumbel_anchor_gcn_forward.2
= control target key start
LH: loop header
LB: loop body
LE: loop exit
PB: predicated region body
PF: predicated region fallthrough
CT: control target
= control target key end

     0   :  { %vm29_vm0 = vcmask 261120   ;;  %s345_s1 = inlined_call_operand.vmem [shape: f32[128,32], index: 1, kind: input, shape index: {}]   ;;  %s346_s0 = inlined_call_operand.vmem [shape: f32[16,32], index: 0, kind: input, shape index: {}]   ;;  %s347_s2 = inlined_call_operand.vmem [shape: f32[16,128], index: 2, kind: output, shape index: {}]  }
   0x1   :  { %v28_v0 = vld [vmem:[%s345_s1 + $0x78] sm:$0xff]  ;;  %v27_v1 = vld [vmem:[%s345_s1 + $0x70] sm:$0xff]  ;;  %v26_v2 = vld [vmem:[%s345_s1 + $0x68] sm:$0xff] }
   0x2   :  { %201 = vmatprep.subr.msk.mxu0 %vm29_vm0, %v28_v0  ;;  %v11_v3 = vld [vmem:[%s346_s0] sm:$0xff]  ;;  %v24_v5 = vld [vmem:[%s345_s1 + $0x58] sm:$0xff]  ;;  %v23_v6 = vld [vmem:[%s345_s1 + $0x50] sm:$0xff] }
   0x3   :  { %202 = vmatpush3.xpose.msk.msra.mxu0 %vm29_vm0, %v28_v0  ;;  %233 = vmatprep.mubr.msk.f32.mxu0 %vm29_vm0, %v11_v3  ;;  %v25_v4 = vld [vmem:[%s345_s1 + $0x60] sm:$0xff]  ;;  %v22_v7 = vld [vmem:[%s345_s1 + $0x48] sm:$0xff]  ;;  %v20_v9 = vld [vmem:[%s345_s1 + $0x38] sm:$0xff] }
   0x4   :  { %203 = vmatprep.subr.msk.mxu0 %vm29_vm0, %v27_v1  ;;  %v21_v8 = vld [vmem:[%s345_s1 + $0x40] sm:$0xff]  ;;  %v19_v10 = vld [vmem:[%s345_s1 + $0x30] sm:$0xff]  ;;  %v18_v11 = vld [vmem:[%s345_s1 + $0x28] sm:$0xff] }
   0x5   :  { %v17_v12 = vld [vmem:[%s345_s1 + $0x20] sm:$0xff]  ;;  %v16_v13 = vld [vmem:[%s345_s1 + $0x18] sm:$0xff]  ;;  %v15_v14 = vld [vmem:[%s345_s1 + $0x10] sm:$0xff] }
   0x6   :  { %v14_v15 = vld [vmem:[%s345_s1 + $0x8] sm:$0xff]  ;;  %v13_v16 = vld [vmem:[%s345_s1] sm:$0xff] }
   0x7   :  { %204 = vmatpush3.xpose.msk.msra.mxu0 %vm29_vm0, %v27_v1  ;;  %v12_v17 = vld [vmem:[%s346_s0 + $0x8] sm:$0xff] }
   0x8   :  { %205 = vmatprep.subr.msk.mxu0 %vm29_vm0, %v26_v2 }
   0xb   :  { %206 = vmatpush3.xpose.msk.msra.mxu0 %vm29_vm0, %v26_v2 }
   0xc   :  { %207 = vmatprep.subr.msk.mxu0 %vm29_vm0, %v25_v4 }
   0xf   :  { %208 = vmatpush3.xpose.msk.msra.mxu0 %vm29_vm0, %v25_v4 }
  0x10   :  { %209 = vmatprep.subr.msk.mxu0 %vm29_vm0, %v24_v5 }
  0x13   :  { %210 = vmatpush3.xpose.msk.msra.mxu0 %vm29_vm0, %v24_v5 }
  0x14   :  { %211 = vmatprep.subr.msk.mxu0 %vm29_vm0, %v23_v6 }
  0x17   :  { %212 = vmatpush3.xpose.msk.msra.mxu0 %vm29_vm0, %v23_v6 }
  0x18   :  { %213 = vmatprep.subr.msk.mxu0 %vm29_vm0, %v22_v7 }
  0x1b   :  { %214 = vmatpush3.xpose.msk.msra.mxu0 %vm29_vm0, %v22_v7 }
  0x1c   :  { %215 = vmatprep.subr.msk.mxu0 %vm29_vm0, %v21_v8 }
  0x1f   :  { %216 = vmatpush3.xpose.msk.msra.mxu0 %vm29_vm0, %v21_v8 }
  0x20   :  { %217 = vmatprep.subr.msk.mxu0 %vm29_vm0, %v20_v9 }
  0x23   :  { %218 = vmatpush3.xpose.msk.msra.mxu0 %vm29_vm0, %v20_v9 }
  0x24   :  { %219 = vmatprep.subr.msk.mxu0 %vm29_vm0, %v19_v10 }
  0x27   :  { %220 = vmatpush3.xpose.msk.msra.mxu0 %vm29_vm0, %v19_v10 }
  0x28   :  { %221 = vmatprep.subr.msk.mxu0 %vm29_vm0, %v18_v11 }
  0x2b   :  { %222 = vmatpush3.xpose.msk.msra.mxu0 %vm29_vm0, %v18_v11 }
  0x2c   :  { %223 = vmatprep.subr.msk.mxu0 %vm29_vm0, %v17_v12 }
  0x2f   :  { %224 = vmatpush3.xpose.msk.msra.mxu0 %vm29_vm0, %v17_v12 }
  0x30   :  { %225 = vmatprep.subr.msk.mxu0 %vm29_vm0, %v16_v13 }
  0x33   :  { %226 = vmatpush3.xpose.msk.msra.mxu0 %vm29_vm0, %v16_v13 }
  0x34   :  { %227 = vmatprep.subr.msk.mxu0 %vm29_vm0, %v15_v14 }
  0x37   :  { %228 = vmatpush3.xpose.msk.msra.mxu0 %vm29_vm0, %v15_v14 }
  0x38   :  { %229 = vmatprep.subr.msk.mxu0 %vm29_vm0, %v14_v15 }
  0x3b   :  { %230 = vmatpush3.xpose.msk.msra.mxu0 %vm29_vm0, %v14_v15 }
  0x3c   :  { %231 = vmatprep.subr.msk.mxu0 %vm29_vm0, %v13_v16 }
  0x3f   :  { %232 = vmatpush3.xpose.msk.msra.mxu0 %vm29_vm0, %v13_v16 }
  0x42   :  { %234 = vmatmul.mubr.msk.f32.vlgmr.msra.gmra.mxu0 %vm29_vm0, %v12_v17 }
 0x102   :  { %v235_v18 = vpop.f32.mrf.mxu0 }
 0x103   :  { %160 = vst [vmem:[%s347_s2 + $0x8] sm:$0xff] %v235_v18 }
 0x104   :  { %v150_v19 = vpop.f32.mrf.mxu0 }
 0x105   :  { %159 = vst [vmem:[%s347_s2] sm:$0xff] %v150_v19 }

// kernel: dual_gumbel_anchor_gcn_forward.3
= control target key start
LH: loop header
LB: loop body
LE: loop exit
PB: predicated region body
PF: predicated region fallthrough
CT: control target
= control target key end

     0   :  { %s2675_s27 = smov 0   ;;  %s3025_s0 = inlined_call_operand.vmem [shape: f32[2,4,16,16], index: 0, kind: input, shape index: {}]   ;;  %s3026_s1 = inlined_call_operand.vmem [shape: f32[16,32], index: 1, kind: input, shape index: {}]   ;;  %s3027_s2 = inlined_call_operand.vmem [shape: f32[2,8,16], index: 2, kind: input, shape index: {}]   ;;  %s3028_s3 = inlined_call_operand.vmem [shape: f32[2,1,16], index: 3, kind: input, shape index: {}]   ;;  %s3029_s4 = inlined_call_operand.vmem [shape: f32[2,1,16], index: 4, kind: input, shape index: {}]   ;;  %s3030_s5 = inlined_call_operand.vmem [shape: f32[2,128,32], index: 5, kind: input, shape index: {}]   ;;  %s3031_s6 = inlined_call_operand.vmem [shape: f32[2,128,32], index: 6, kind: input, shape index: {}]   ;;  %s3032_s7 = inlined_call_operand.vmem [shape: f32[2,1,128], index: 7, kind: input, shape index: {}]   ;;  %s3033_s8 = inlined_call_operand.vmem [shape: f32[2,16,128], index: 8, kind: output, shape index: {}]  }
   0x1 LB: > { %s2681_s28 = sadd.s32 4294967295, %s2626_s27   ;;  %p2179_p0 = scmp.ge.s32.totalorder %s2626_s27, 1  ;;  %s2626_s27 = sphi %s2675_s27, %s18_s27  }
   0x2   : > { %p315_p1 = scmp.lt.s32.totalorder %s2626_s27, 3 }
   0x4   : > { %p316_p2 = pnand %p2179_p0, %p315_p1 }
   0x5   : > { %p372_p3 = scmp.lt.s32.totalorder (!%p316_p2), %s2681_s28, 1  ;;  %s831_s22 = scvt.s32.f32 (!%p316_p2), %s2681_s28 }
   0x6   : > { %319 = sbr.rel (%p316_p2) target bundleno = 1354 (0x54a), region = 52  ;;  %p1739_p4 = scmp.eq.s32.totalorder (!%p316_p2), %s2681_s28, 1 }
   0x7   : > { %s832_s23 = smul.f32 (!%p316_p2), 2.0, %s831_s22 }
   0x9   : > { %s2199_s24 = sadd.f32 (!%p316_p2), -1.0, %s832_s23 }
   0xb   : > { %v2628_v0 = vmov 0.0   ;;  %s2689_s29 = scalar_select %p372_p3, %s2681_s28, 1  ;;  %vm2629_vm0 = vmmov 0   ;;  %vm408_vm1 = vcmask 130048   ;;  %vm1006_vm2 = vcmask 64512  }
   0xc   : > { %2348 = vmatprep.subr.mxu0 %v2628_v0  ;;  %2355 = vmatprep.subr.mxu1 %v2628_v0  ;;  %vm1787_vm3 = vcmask 261120   ;;  %s1740_s17 = scalar_select %p1739_p4, 1, 0 }
   0xd   : > { %2352 = vmatprep.mubr.msk.f32.mxu0 %vm2629_vm0, %v2628_v0  ;;  %2359 = vmatprep.mubr.msk.f32.mxu1 %vm2629_vm0, %v2628_v0  ;;  %s2278_s30 = sshll.u32 %s2689_s29, 6  ;;  %s2182_s9 = sshll.u32 %s2689_s29, 3 }
   0xe   : > { %s376_s12 = scalar_lea.vmem %s3025_s0, %s2278_s30  ;;  %s380_s15 = scalar_lea.vmem %s3027_s2, %s2182_s9 }
   0xf   : > { %v2703_v1 = vld [vmem:[%s376_s12 + $0x8] sm:$0xff]  ;;  %v2705_v2 = vld [vmem:[%s376_s12 + $0x18] sm:$0xff]  ;;  %v2707_v3 = vld [vmem:[%s376_s12] sm:$0xff]  ;;  %s386_s18 = scalar_lea.vmem %s3029_s4, %s2689_s29  ;;  %s383_s21 = scalar_lea.vmem %s3028_s3, %s2689_s29 }
  0x10   : > { %2349 = vmatpush3.msra.mxu0 %v2703_v1  ;;  %2356 = vmatpush3.msra.mxu1 %v2705_v2  ;;  %v2711_v4 = vld [vmem:[%s376_s12 + $0x10] sm:$0xff]  ;;  %v407_v5 = vld [vmem:[%s380_s15] sm:$0xff]  ;;  %v2717_v6 = vld [vmem:[%s376_s12 + $0x28] sm:$0xff]  ;;  %v483_v9 = vmul.f32 %v2707_v3, %v2707_v3  ;;  %v484_v12 = vmul.f32 %v2703_v1, %v2703_v1  ;;  %v590_v13 = vmul.f32 %v2705_v2, %v2705_v2  ;;  %s2279_s10 = sshll.u32 %s2689_s29, 7  ;;  %s2281_s22 = sshll.u32 %s2689_s29, 4 }
  0x11   : > { %2350 = vmatprep.subr.mxu0 %v2628_v0  ;;  %2357 = vmatprep.subr.mxu1 %v2628_v0  ;;  %v2719_v7 = vld [vmem:[%s376_s12 + $0x38] sm:$0xff]  ;;  %v589_v8 = vmul.f32 %v2711_v4, %v2711_v4  ;;  %v2729_v10 = vld [vmem:[%s376_s12 + $0x20] sm:$0xff]  ;;  %v2733_v11 = vld [vmem:[%s376_s12 + $0x30] sm:$0xff]  ;;  %v696_v17 = vmul.f32 %v2717_v6, %v2717_v6  ;;  %s2898_s13 = scalar_lea.vmem %s3031_s6, %s2279_s10  ;;  %s2949_s16 = scalar_lea.vmem %s3030_s5, %s2279_s10 }
  0x12   : > { %2351 = vmatpush3.msra.mxu0 %v2707_v3  ;;  %2358 = vmatpush3.msra.mxu1 %v2711_v4  ;;  %v485_v15 = vsel %vm408_vm1, %v483_v9, 0.0  ;;  %v594_v16 = vsel %vm408_vm1, %v590_v13, 0.0  ;;  %v488_v18 = vsel %vm408_vm1, %v484_v12, 0.0  ;;  %v695_v19 = vmul.f32 %v2729_v10, %v2729_v10  ;;  %v2206_v24 = vld [vmem:[%s386_s18] ss:$0 sm:$0xff]  ;;  %s1741_s18 = scvt.s32.f32 %s1740_s17  ;;  %s404_s25 = scalar_lea.vmem %s3033_s8, %s2281_s22 }
  0x13   : > { %2353 = vmatmul.mubr.msk.f32.vlgmr.msra.gmra.mxu0 %vm408_vm1, %v407_v5  ;;  %2360 = vmatmul.mubr.msk.f32.vlgmr.msra.gmra.mxu1 %vm408_vm1, %v407_v5  ;;  %v591_v14 = vsel %vm408_vm1, %v589_v8, 0.0  ;;  %v700_v20 = vsel %vm408_vm1, %v696_v17, 0.0  ;;  %v802_v21 = vmul.f32 %v2719_v7, %v2719_v7  ;;  %v801_v23 = vmul.f32 %v2733_v11, %v2733_v11  ;;  %v2203_v41 = vld [vmem:[%s383_s21] ss:$0 sm:$0xff]  ;;  %s399_s21 = scalar_lea.vmem %s3032_s7, %s2689_s29 }
  0x14   : > { %2362 = vmatprep.subr.mxu0 %v2628_v0  ;;  %2369 = vmatprep.subr.mxu1 %v2628_v0  ;;  %v697_v22 = vsel %vm408_vm1, %v695_v19, 0.0  ;;  %v1132_v26 = vmul.f32 %v2206_v24, %v2711_v4  ;;  %v959_v28 = vmul.f32 %v2206_v24, %v2707_v3  ;;  %v1133_v30 = vmul.f32 %v2206_v24, %v2705_v2  ;;  %s1742_s19 = ssub.f32 1.0, %s1741_s18 }
  0x15   : > { %2363 = vmatpush3.msra.mxu0 %v2717_v6  ;;  %2370 = vmatpush3.msra.mxu1 %v2719_v7  ;;  %v806_v25 = vsel %vm408_vm1, %v802_v21, 0.0  ;;  %v803_v27 = vsel %vm408_vm1, %v801_v23, 0.0  ;;  %v960_v32 = vmul.f32 %v2206_v24, %v2703_v1  ;;  %v1304_v34 = vmul.f32 %v2206_v24, %v2717_v6 }
  0x16   : > { %2364 = vmatprep.subr.mxu0 %v2628_v0  ;;  %2371 = vmatprep.subr.mxu1 %v2628_v0  ;;  %v1134_v29 = vsel %vm408_vm1, %v1132_v26, 0.0  ;;  %v961_v31 = vsel %vm408_vm1, %v959_v28, 0.0  ;;  %v1137_v33 = vsel %vm408_vm1, %v1133_v30, 0.0  ;;  %v1303_v36 = vmul.f32 %v2206_v24, %v2729_v10 }
  0x17   : > { %2365 = vmatpush3.msra.mxu0 %v2729_v10  ;;  %2366 = vmatprep.mubr.msk.f32.mxu0 %vm2629_vm0, %v2628_v0  ;;  %v964_v35 = vsel %vm408_vm1, %v960_v32, 0.0  ;;  %v1308_v37 = vsel %vm408_vm1, %v1304_v34, 0.0  ;;  %v1475_v38 = vmul.f32 %v2206_v24, %v2719_v7  ;;  %v1474_v40 = vmul.f32 %v2206_v24, %v2733_v11 }
  0x18   : > { %2372 = vmatpush3.msra.mxu1 %v2733_v11  ;;  %2373 = vmatprep.mubr.msk.f32.mxu1 %vm2629_vm0, %v2628_v0  ;;  %v1305_v39 = vsel %vm408_vm1, %v1303_v36, 0.0  ;;  %v1110_v43 = vmul.f32 %v2203_v41, %v2711_v4  ;;  %v930_v45 = vmul.f32 %v2203_v41, %v2707_v3  ;;  %v931_v47 = vmul.f32 %v2203_v41, %v2703_v1 }
  0x19   : > { %2367 = vmatmul.mubr.msk.f32.vlgmr.msra.gmra.mxu0 %vm408_vm1, %v407_v5  ;;  %2374 = vmatmul.mubr.msk.f32.vlgmr.msra.gmra.mxu1 %vm408_vm1, %v407_v5  ;;  %v1479_v42 = vsel %vm408_vm1, %v1475_v38, 0.0  ;;  %v1476_v44 = vsel %vm408_vm1, %v1474_v40, 0.0  ;;  %v1281_v50 = vmul.f32 %v2203_v41, %v2729_v10  ;;  %v1111_v52 = vmul.f32 %v2203_v41, %v2705_v2 }
  0x1a   : > { %592 = vadd.xlane.f32.xlu1 %v591_v14  ;;  %486 = vadd.xlane.f32.xlu0 %v485_v15  ;;  %v1112_v46 = vsel %vm408_vm1, %v1110_v43, 0.0  ;;  %v932_v48 = vsel %vm408_vm1, %v930_v45, 0.0  ;;  %v935_v49 = vsel %vm408_vm1, %v931_v47, 0.0  ;;  %v1282_v58 = vmul.f32 %v2203_v41, %v2717_v6 }
  0x1b   : > { %2383 = vmatprep.mubr.msk.f32.mxu1 %vm408_vm1, %v2711_v4  ;;  %2378 = vmatprep.mubr.msk.f32.mxu0 %vm408_vm1, %v2707_v3  ;;  %v1283_v51 = vsel %vm408_vm1, %v1281_v50, 0.0  ;;  %v1115_v53 = vsel %vm408_vm1, %v1111_v52, 0.0  ;;  %v1453_v3 = vmul.f32 %v2203_v41, %v2719_v7  ;;  %v1452_v19 = vmul.f32 %v2203_v41, %v2733_v11 }
  0x1c   : > { %v1286_v63 = vsel %vm408_vm1, %v1282_v58, 0.0 }
  0x1d   : > { %v1457_v17 = vsel %vm408_vm1, %v1453_v3, 0.0 }
  0x1e   : > { %595 = vadd.xlane.f32.xlu1 %v594_v16  ;;  %489 = vadd.xlane.f32.xlu0 %v488_v18 }
  0x22   : > { %701 = vadd.xlane.f32.xlu1 %v700_v20  ;;  %698 = vadd.xlane.f32.xlu0 %v697_v22  ;;  %v1454_v22 = vsel %vm408_vm1, %v1452_v19, 0.0 }
  0x26   : > { %807 = vadd.xlane.f32.xlu1 %v806_v25  ;;  %804 = vadd.xlane.f32.xlu0 %v803_v27 }
  0x2a   : > { %1135 = vadd.xlane.f32.xlu1 %v1134_v29  ;;  %962 = vadd.xlane.f32.xlu0 %v961_v31 }
  0x2e   : > { %1138 = vadd.xlane.f32.xlu1 %v1137_v33  ;;  %965 = vadd.xlane.f32.xlu0 %v964_v35 }
  0x32   : > { %1309 = vadd.xlane.f32.xlu1 %v1308_v37  ;;  %1306 = vadd.xlane.f32.xlu0 %v1305_v39 }
  0x36   : > { %1480 = vadd.xlane.f32.xlu1 %v1479_v42  ;;  %1477 = vadd.xlane.f32.xlu0 %v1476_v44 }
  0x3a   : > { %1113 = vadd.xlane.f32.xlu1 %v1112_v46  ;;  %933 = vadd.xlane.f32.xlu0 %v932_v48 }
  0x3e   : > { %936 = vadd.xlane.f32.xlu1 %v935_v49  ;;  %1116 = vadd.xlane.f32.xlu0 %v1115_v53 }
  0x42   : > { %1284 = vadd.xlane.f32.xlu1 %v1283_v51 }
  0xd3   : > { %v583_v54 = vpop.f32.mrf.mxu1  ;;  %v478_v55 = vpop.f32.mrf.mxu0 }
  0xd4   : > { %588 = vst.msk [vmem:[#allocation2 + $0x8] sm:$0xff] %vm408_vm1, %v583_v54  ;;  %v605_v56 = vmul.f32 %v583_v54, %v583_v54  ;;  %482 = vst.msk [vmem:[#allocation2] sm:$0xff] %vm408_vm1, %v478_v55  ;;  %v499_v57 = vmul.f32 %v478_v55, %v478_v55 }
  0xd5   : > { %v2354_v59 = vpop.f32.mrf.mxu0  ;;  %v2361_v60 = vpop.f32.mrf.mxu1 }
  0xd6   : > { %v606_v61 = vsel %vm408_vm1, %v605_v56, 0.0  ;;  %v500_v62 = vsel %vm408_vm1, %v499_v57, 0.0 }
  0xd7   : > { %607 = vadd.xlane.f32.xlu1 %v606_v61  ;;  %501 = vadd.xlane.f32.xlu0 %v500_v62 }
  0xd9   : > { %v795_v4 = vpop.f32.mrf.mxu1  ;;  %v689_v5 = vpop.f32.mrf.mxu0 }
  0xda   : > { %800 = vst.msk [vmem:[#allocation2 + $0x18] sm:$0xff] %vm408_vm1, %v795_v4  ;;  %v817_v8 = vmul.f32 %v795_v4, %v795_v4  ;;  %694 = vst.msk [vmem:[#allocation2 + $0x10] sm:$0xff] %vm408_vm1, %v689_v5  ;;  %v711_v9 = vmul.f32 %v689_v5, %v689_v5 }
  0xdb   : > { %v2368_v12 = vpop.f32.mrf.mxu0  ;;  %1287 = vadd.xlane.f32.xlu1 %v1286_v63  ;;  %v836_v13 = vld [vmem:[#allocation2] sm:$0xff]  ;;  %v1023_v14 = vld [vmem:[#allocation2 + $0x8] sm:$0xff]  ;;  %v2375_v15 = vpop.f32.mrf.mxu1 }
  0xdc   : > { %v712_v16 = vsel %vm408_vm1, %v711_v9, 0.0  ;;  %2376 = vmatprep.subr.msk.mxu0 %vm408_vm1, %v836_v13  ;;  %2381 = vmatprep.subr.msk.mxu1 %vm408_vm1, %v1023_v14  ;;  %v818_v18 = vsel %vm408_vm1, %v817_v8, 0.0 }
  0xdd   : > { %713 = vadd.xlane.f32.xlu0 %v712_v16  ;;  %2377 = vmatpush3.xpose.msk.msra.mxu0 %vm408_vm1, %v836_v13 }
  0xde   : > { %2382 = vmatpush3.xpose.msk.msra.mxu1 %vm408_vm1, %v1023_v14 }
  0xdf   : > { %1458 = vadd.xlane.f32.xlu1 %v1457_v17 }
  0xe0   : > { %2379 = vmatmul.mubr.msk.f32.vlgmr.msra.gmra.mxu0 %vm408_vm1, %v2703_v1  ;;  %v487_v1 = vpop.xlane.xlu0 %486 }
  0xe1   : > { %819 = vadd.xlane.f32.xlu0 %v818_v18  ;;  %2384 = vmatmul.mubr.msk.f32.vlgmr.msra.gmra.mxu1 %vm408_vm1, %v2705_v2  ;;  %v1194_v20 = vld [vmem:[#allocation2 + $0x10] sm:$0xff]  ;;  %v1365_v21 = vld [vmem:[#allocation2 + $0x18] sm:$0xff]  ;;  %v593_v2 = vpop.xlane.xlu1 %592 }
  0xe2   : > { %2386 = vmatprep.subr.msk.mxu0 %vm408_vm1, %v1194_v20  ;;  %2391 = vmatprep.subr.msk.mxu1 %vm408_vm1, %v1365_v21 }
  0xe3   : > { %2387 = vmatpush3.xpose.msk.msra.mxu0 %vm408_vm1, %v1194_v20  ;;  %2392 = vmatpush3.xpose.msk.msra.mxu1 %vm408_vm1, %v1365_v21 }
  0xe4   : > { %2388 = vmatprep.mubr.msk.f32.mxu0 %vm408_vm1, %v2729_v10  ;;  %2393 = vmatprep.mubr.msk.f32.mxu1 %vm408_vm1, %v2733_v11  ;;  %v490_v23 = vpop.xlane.xlu0 %489 }
  0xe5   : > { %1455 = vadd.xlane.f32.xlu0 %v1454_v22  ;;  %2396 = vmatprep.subr.mxu0 %v2628_v0  ;;  %v596_v24 = vpop.xlane.xlu1 %595  ;;  %v491_v26 = vadd.f32 %v490_v23, %v487_v1 }
  0xe6   : > { %2389 = vmatmul.mubr.msk.f32.vlgmr.msra.gmra.mxu0 %vm408_vm1, %v2717_v6  ;;  %2394 = vmatmul.mubr.msk.f32.vlgmr.msra.gmra.mxu1 %vm408_vm1, %v2719_v7  ;;  %v597_v25 = vadd.f32 %v596_v24, %v593_v2 }
  0xe7   : > { %2400 = vmatprep.mubr.msk.f32.mxu0 %vm2629_vm0, %v2628_v0  ;;  %v492_v28 = vrot.slane %v491_v26, 4 }
  0xe8   : > { %v699_v10 = vpop.xlane.xlu0 %698  ;;  %v598_v27 = vrot.slane %v597_v25, 4 }
  0xe9   : > { %v702_v11 = vpop.xlane.xlu1 %701  ;;  %v493_v32 = vadd.f32 %v492_v28, %v491_v26 }
  0xea   : > { %v703_v29 = vadd.f32 %v702_v11, %v699_v10  ;;  %v599_v6 = vadd.f32 %v598_v27, %v597_v25 }
  0xeb   : > { %v494_v35 = vrot.slane %v493_v32, 2 }
  0xec   : > { %v805_v30 = vpop.xlane.xlu0 %804  ;;  %v704_v33 = vrot.slane %v703_v29, 4  ;;  %v600_v34 = vrot.slane %v599_v6, 2 }
  0xed   : > { %v808_v31 = vpop.xlane.xlu1 %807  ;;  %v495_v41 = vadd.f32 %v494_v35, %v493_v32 }
  0xee   : > { %v809_v7 = vadd.f32 %v808_v31, %v805_v30  ;;  %v705_v36 = vadd.f32 %v704_v33, %v703_v29  ;;  %v601_v40 = vadd.f32 %v600_v34, %v599_v6 }
  0xef   : > { %v496_v46 = vrot.slane %v495_v41, 1 }
  0xf0   : > { %v810_v37 = vrot.slane %v809_v7, 4  ;;  %v963_v38 = vpop.xlane.xlu0 %962  ;;  %v706_v42 = vrot.slane %v705_v36, 2  ;;  %v602_v45 = vrot.slane %v601_v40, 1 }
  0xf1   : > { %v1136_v39 = vpop.xlane.xlu1 %1135  ;;  %v497_v51 = vadd.f32 %v496_v46, %v495_v41 }
  0xf2   : > { %v811_v43 = vadd.f32 %v810_v37, %v809_v7  ;;  %v707_v47 = vadd.f32 %v706_v42, %v705_v36  ;;  %v603_v50 = vadd.f32 %v602_v45, %v601_v40 }
  0xf4   : > { %v966_v44 = vpop.xlane.xlu0 %965  ;;  %v812_v48 = vrot.slane %v811_v43, 2  ;;  %v708_v52 = vrot.slane %v707_v47, 1  ;;  %v604_v56 = vadd.f32 %v603_v50, %v497_v51 }
  0xf5   : > { %v1139_v49 = vpop.xlane.xlu1 %1138 }
  0xf6   : > { %v813_v53 = vadd.f32 %v812_v48, %v811_v43  ;;  %v709_v57 = vadd.f32 %v708_v52, %v707_v47 }
  0xf8   : > { %v1307_v54 = vpop.xlane.xlu0 %1306  ;;  %v814_v58 = vrot.slane %v813_v53, 1  ;;  %v710_v60 = vadd.f32 %v709_v57, %v604_v56 }
  0xf9   : > { %v1310_v55 = vpop.xlane.xlu1 %1309 }
  0xfa   : > { %v815_v61 = vadd.f32 %v814_v58, %v813_v53 }
  0xfc   : > { %v1478_v59 = vpop.xlane.xlu0 %1477  ;;  %v816_v63 = vadd.f32 %v815_v61, %v710_v60 }
  0xfd   : > { %v1481_v62 = vpop.xlane.xlu1 %1480 }
  0xfe   : > { %2488 = vrsqrt.f32 %v816_v63 }
 0x100   : > { %v934_v3 = vpop.xlane.xlu0 %933 }
 0x101   : > { %v1114_v4 = vpop.xlane.xlu1 %1113 }
 0x104   : > { %v1117_v5 = vpop.xlane.xlu0 %1116 }
 0x105   : > { %v937_v8 = vpop.xlane.xlu1 %936 }
 0x109   : > { %v1285_v12 = vpop.xlane.xlu1 %1284 }
 0x10b   : > { %v2840_v13 = vpop.eup %2488 }
 0x10c   : > { %v968_v14 = vmul.f32 %v2840_v13, %v966_v44  ;;  %v1141_v15 = vmul.f32 %v2840_v13, %v1139_v49  ;;  %v967_v17 = vmul.f32 %v2840_v13, %v963_v38  ;;  %v1140_v19 = vmul.f32 %v2840_v13, %v1136_v39 }
 0x10d   : > { %v1312_v22 = vmul.f32 %v2840_v13, %v1310_v55  ;;  %v1483_v1 = vmul.f32 %v2840_v13, %v1481_v62  ;;  %v1311_v26 = vmul.f32 %v2840_v13, %v1307_v54  ;;  %v1482_v30 = vmul.f32 %v2840_v13, %v1478_v59 }
 0x10e   : > { %v2208_v20 = vmul.f32 -1.442695, %v968_v14  ;;  %v2217_v21 = vmul.f32 -1.442695, %v1141_v15  ;;  %v2207_v2 = vmul.f32 -1.442695, %v967_v17  ;;  %v1118_v33 = vmul.f32 %v2840_v13, %v1114_v4 }
 0x10f   : > { %v2216_v25 = vmul.f32 -1.442695, %v1140_v19  ;;  %v2226_v28 = vmul.f32 -1.442695, %v1312_v22  ;;  %v2235_v29 = vmul.f32 -1.442695, %v1483_v1  ;;  %v939_v34 = vmul.f32 %v2840_v13, %v937_v8 }
 0x110   : > { %2490 = vpow2.f32 %v2208_v20  ;;  %v2225_v7 = vmul.f32 -1.442695, %v1311_v26  ;;  %v2234_v36 = vmul.f32 -1.442695, %v1482_v30  ;;  %v938_v37 = vmul.f32 %v2840_v13, %v934_v3 }
 0x111   : > { %2492 = vpow2.f32 %v2217_v21  ;;  %v1119_v38 = vmul.f32 %v2840_v13, %v1117_v5  ;;  %v2214_v43 = vmul.f32 -1.442695, %v1118_v33  ;;  %v1289_v44 = vmul.f32 %v2840_v13, %v1285_v12 }
 0x112   : > { %2494 = vpow2.f32 %v2207_v2  ;;  %v2205_v45 = vmul.f32 -1.442695, %v939_v34  ;;  %v2204_v51 = vmul.f32 -1.442695, %v938_v37 }
 0x113   : > { %2496 = vpow2.f32 %v2216_v25  ;;  %v2215_v49 = vmul.f32 -1.442695, %v1119_v38  ;;  %v2223_v55 = vmul.f32 -1.442695, %v1289_v44 }
 0x114   : > { %2498 = vpow2.f32 %v2226_v28 }
 0x115   : > { %2500 = vpow2.f32 %v2235_v29 }
 0x116   : > { %2502 = vpow2.f32 %v2225_v7 }
 0x117   : > { %2504 = vpow2.f32 %v2234_v36 }
 0x118   : > { %2506 = vpow2.f32 %v2214_v43 }
 0x119   : > { %2508 = vpow2.f32 %v2205_v45 }
 0x11a   : > { %2510 = vpow2.f32 %v2215_v49 }
 0x11b   : > { %2512 = vpow2.f32 %v2204_v51 }
 0x11c   : > { %2514 = vpow2.f32 %v2223_v55 }
 0x11d   : > { %v2491_v59 = vpop.eup %2490 }
 0x11e   : > { %v2493_v61 = vpop.eup %2492 }
 0x11f   : > { %v2495_v4 = vpop.eup %2494  ;;  %v1149_v14 = vadd.f32 1.0, %v2493_v61  ;;  %v981_v61 = vstv %s2199_s24 }
 0x120   : > { %v2497_v8 = vpop.eup %2496 }
 0x121   : > { %v2499_v15 = vpop.eup %2498  ;;  %v1148_v21 = vadd.f32 1.0, %v2497_v8 }
 0x122   : > { %v2501_v20 = vpop.eup %2500  ;;  %v1320_v2 = vadd.f32 1.0, %v2499_v15 }
 0x123   : > { %v2503_v1 = vpop.eup %2502 }
 0x160   : > { %v502_v9 = vpop.xlane.xlu0 %501  ;;  %v608_v18 = vpop.xlane.xlu1 %607 }
 0x161   : > { %v609_v23 = vrot.slane %v608_v18, 4  ;;  %v503_v24 = vrot.slane %v502_v9, 4 }
 0x163   : > { %v610_v31 = vadd.f32 %v609_v23, %v608_v18  ;;  %v504_v6 = vadd.f32 %v503_v24, %v502_v9  ;;  %v976_v9 = vadd.f32 1.0, %v2491_v59  ;;  %v2505_v23 = vpop.eup %2504  ;;  %v1491_v24 = vadd.f32 1.0, %v2501_v20 }
 0x164   : > { %v1288_v11 = vpop.xlane.xlu1 %1287  ;;  %v2507_v26 = vpop.eup %2506  ;;  %v1490_v29 = vadd.f32 1.0, %v2505_v23 }
 0x165   : > { %v611_v39 = vrot.slane %v610_v31, 2  ;;  %v505_v40 = vrot.slane %v504_v6, 2  ;;  %v1290_v46 = vmul.f32 %v2840_v13, %v1288_v11  ;;  %v1319_v11 = vadd.f32 1.0, %v2503_v1  ;;  %v2509_v28 = vpop.eup %2508 }
 0x166   : > { %v714_v16 = vpop.xlane.xlu0 %713  ;;  %v2511_v30 = vpop.eup %2510  ;;  %v947_v33 = vadd.f32 1.0, %v2509_v28  ;;  %v1126_v37 = vadd.f32 1.0, %v2507_v26 }
 0x167   : > { %v715_v27 = vrot.slane %v714_v16, 4  ;;  %v612_v52 = vadd.f32 %v611_v39, %v610_v31  ;;  %v506_v53 = vadd.f32 %v505_v40, %v504_v6  ;;  %v2224_v57 = vmul.f32 -1.442695, %v1290_v46  ;;  %v2513_v6 = vpop.eup %2512 }
 0x168   : > { %v1459_v41 = vpop.xlane.xlu1 %1458  ;;  %v1127_v34 = vadd.f32 1.0, %v2511_v30  ;;  %v946_v36 = vadd.f32 1.0, %v2513_v6 }
 0x169   : > { %v716_v35 = vadd.f32 %v715_v27, %v714_v16  ;;  %v1461_v50 = vmul.f32 %v2840_v13, %v1459_v41  ;;  %v613_v62 = vrot.slane %v612_v52, 1  ;;  %v507_v63 = vrot.slane %v506_v53, 1 }
 0x16a   : > { %v820_v10 = vpop.xlane.xlu0 %819  ;;  %2516 = vpow2.f32 %v2224_v57  ;;  %v975_v16 = vadd.f32 1.0, %v2495_v4 }
 0x16b   : > { %v821_v32 = vrot.slane %v820_v10, 4  ;;  %v717_v47 = vrot.slane %v716_v35, 2  ;;  %v2233_v60 = vmul.f32 -1.442695, %v1461_v50  ;;  %v614_v17 = vadd.f32 %v613_v62, %v612_v52 }
 0x16c   : > { %v508_v18 = vadd.f32 %v507_v63, %v506_v53 }
 0x16d   : > { %v822_v42 = vadd.f32 %v821_v32, %v820_v10  ;;  %v718_v58 = vadd.f32 %v717_v47, %v716_v35  ;;  %2518 = vpow2.f32 %v2233_v60  ;;  %v2515_v32 = vpop.eup %2514 }
 0x16e   : > { %v1456_v48 = vpop.xlane.xlu0 %1455  ;;  %v615_v10 = vadd.f32 %v614_v17, %v508_v18  ;;  %v1297_v43 = vadd.f32 1.0, %v2515_v32 }
 0x16f   : > { %v823_v54 = vrot.slane %v822_v42, 2  ;;  %v1460_v56 = vmul.f32 %v2840_v13, %v1456_v48  ;;  %v719_v12 = vrot.slane %v718_v58, 1 }
 0x171   : > { %v824_v3 = vadd.f32 %v823_v54, %v822_v42  ;;  %v2232_v5 = vmul.f32 -1.442695, %v1460_v56  ;;  %v720_v22 = vadd.f32 %v719_v12, %v718_v58 }
 0x173   : > { %v825_v19 = vrot.slane %v824_v3, 1  ;;  %2520 = vpow2.f32 %v2232_v5  ;;  %v721_v27 = vadd.f32 %v720_v22, %v615_v10 }
 0x174   : > { %2522 = vrcp.f32 %v976_v9 }
 0x175   : > { %2524 = vrcp.f32 %v1149_v14  ;;  %v826_v25 = vadd.f32 %v825_v19, %v824_v3 }
 0x176   : > { %2526 = vrcp.f32 %v975_v16 }
 0x177   : > { %2528 = vrcp.f32 %v1148_v21  ;;  %v827_v31 = vadd.f32 %v826_v25, %v721_v27  ;;  %v2517_v7 = vpop.eup %2516 }
 0x178   : > { %2530 = vrcp.f32 %v1320_v2  ;;  %v1298_v39 = vadd.f32 1.0, %v2517_v7 }
 0x179   : > { %2532 = vrcp.f32 %v1491_v24 }
 0x17a   : > { %2534 = vrcp.f32 %v1319_v11  ;;  %v2519_v35 = vpop.eup %2518 }
 0x17b   : > { %2536 = vrcp.f32 %v1490_v29  ;;  %v1469_v41 = vadd.f32 1.0, %v2519_v35 }
 0x17c   : > { %2538 = vrsqrt.f32 %v827_v31 }
 0x17d   : > { %2540 = vrcp.f32 %v947_v33 }
 0x17e   : > { %2542 = vrcp.f32 %v1127_v34 }
 0x17f   : > { %2544 = vrcp.f32 %v946_v36 }
 0x180   : > { %v2521_v38 = vpop.eup %2520  ;;  %2546 = vrcp.f32 %v1126_v37 }
 0x181   : > { %v2523_v40 = vpop.eup %2522  ;;  %v1468_v45 = vadd.f32 1.0, %v2521_v38  ;;  %2548 = vrcp.f32 %v1298_v39 }
 0x182   : > { %v2525_v42 = vpop.eup %2524  ;;  %v987_v47 = vmul.f32 -0.1, %v2523_v40  ;;  %2550 = vrcp.f32 %v1469_v41 }
 0x183   : > { %v2527_v44 = vpop.eup %2526  ;;  %v1159_v48 = vmul.f32 -0.1, %v2525_v42  ;;  %2552 = vrcp.f32 %v1297_v43 }
 0x184   : > { %v2529_v46 = vpop.eup %2528  ;;  %v986_v50 = vmul.f32 -0.1, %v2527_v44  ;;  %2554 = vrcp.f32 %v1468_v45 }
 0x185   : > { %v2531_v49 = vpop.eup %2530  ;;  %v1158_v52 = vmul.f32 -0.1, %v2529_v46  ;;  %2556 = vrcp.f32 %v987_v47 }
 0x186   : > { %v2533_v51 = vpop.eup %2532  ;;  %2558 = vrcp.f32 %v1159_v48  ;;  %v1330_v54 = vmul.f32 -0.1, %v2531_v49 }
 0x187   : > { %v2535_v53 = vpop.eup %2534  ;;  %2560 = vrcp.f32 %v986_v50  ;;  %v1501_v56 = vmul.f32 -0.1, %v2533_v51 }
 0x188   : > { %v2537_v55 = vpop.eup %2536  ;;  %2562 = vrcp.f32 %v1158_v52  ;;  %v1329_v58 = vmul.f32 -0.1, %v2535_v53 }
 0x189   : > { %v2539_v57 = vpop.eup %2538  ;;  %2564 = vrcp.f32 %v1330_v54  ;;  %v1500_v60 = vmul.f32 -0.1, %v2537_v55 }
 0x18a   : > { %v2541_v59 = vpop.eup %2540  ;;  %2566 = vrcp.f32 %v1501_v56  ;;  %v830_v63 = vmul.f32 %v2539_v57, %v2840_v13 }
 0x18b   : > { %v2543_v62 = vpop.eup %2542  ;;  %2568 = vrcp.f32 %v1329_v58  ;;  %v983_v9 = vmul.f32 %v2541_v59, %v981_v61 }
 0x18c   : > { %v2545_v3 = vpop.eup %2544  ;;  %2570 = vrcp.f32 %v1500_v60  ;;  %v1155_v16 = vmul.f32 %v2543_v62, %v981_v61 }
 0x18d   : > { %v2547_v5 = vpop.eup %2546  ;;  %v982_v21 = vmul.f32 %v2545_v3, %v981_v61 }
 0x18e   : > { %v2549_v14 = vpop.eup %2548  ;;  %v1154_v23 = vmul.f32 %v2547_v5, %v981_v61 }
 0x18f   : > { %v2551_v18 = vpop.eup %2550  ;;  %v1326_v29 = vmul.f32 %v2549_v14, %v981_v61 }
 0x190   : > { %v2553_v1 = vpop.eup %2552  ;;  %v1497_v31 = vmul.f32 %v2551_v18, %v981_v61 }
 0x191   : > { %v2555_v24 = vpop.eup %2554  ;;  %v1325_v39 = vmul.f32 %v2553_v1, %v981_v61 }
 0x192   : > { %v2557_v26 = vpop.eup %2556  ;;  %v1496_v41 = vmul.f32 %v2555_v24, %v981_v61 }
 0x193   : > { %v2559_v6 = vpop.eup %2558 }
 0x194   : > { %v2561_v35 = vpop.eup %2560 }
 0x195   : > { %v2563_v42 = vpop.eup %2562 }
 0x196   : > { %v2565_v51 = vpop.eup %2564 }
 0x197   : > { %v2567_v55 = vpop.eup %2566 }
 0x198   : > { %v2569_v61 = vpop.eup %2568 }
 0x1a0   : > { %v2380_v4 = vpop.f32.mrf.mxu0 }
 0x1a1   : > { %v922_v8 = vmul.f32 %v2380_v4, %v830_v63  ;;  %v2385_v12 = vpop.f32.mrf.mxu1  ;;  %v2571_v4 = vpop.eup %2570 }
 0x1a2   : > { %v1109_v15 = vmul.f32 %v2385_v12, %v830_v63  ;;  %v912_v17 = vpop.f32.mrf.mxu0 }
 0x1a3   : > { %v985_v19 = vadd.f32 %v983_v9, %v922_v8  ;;  %v921_v20 = vmul.f32 %v912_v17, %v830_v63  ;;  %v1099_v22 = vpop.f32.mrf.mxu1 }
 0x1a4   : > { %v1157_v2 = vadd.f32 %v1155_v16, %v1109_v15  ;;  %v1108_v13 = vmul.f32 %v1099_v22, %v830_v63 }
 0x1a5   : > { %v993_v10 = vmul.f32 %v985_v19, %v985_v19  ;;  %v984_v25 = vadd.f32 %v982_v21, %v921_v20 }
 0x1a6   : > { %v1165_v11 = vmul.f32 %v1157_v2, %v1157_v2  ;;  %v1156_v27 = vadd.f32 %v1154_v23, %v1108_v13  ;;  %v2390_v28 = vpop.f32.mrf.mxu0  ;;  %v2395_v30 = vpop.f32.mrf.mxu1 }
 0x1a7   : > { %v995_v32 = vmul.f32 %v2557_v26, %v993_v10  ;;  %v992_v33 = vmul.f32 %v984_v25, %v984_v25  ;;  %v1280_v7 = vmul.f32 %v2390_v28, %v830_v63  ;;  %v1451_v34 = vmul.f32 %v2395_v30, %v830_v63 }
 0x1a8   : > { %v1167_v36 = vmul.f32 %v2559_v6, %v1165_v11  ;;  %v1164_v37 = vmul.f32 %v1156_v27, %v1156_v27  ;;  %v1270_v38 = vpop.f32.mrf.mxu0  ;;  %v1441_v40 = vpop.f32.mrf.mxu1 }
 0x1a9   : > { %v998_v43 = vmul.f32 1.442695, %v995_v32  ;;  %v994_v44 = vmul.f32 %v2561_v35, %v992_v33  ;;  %v1328_v45 = vadd.f32 %v1326_v29, %v1280_v7  ;;  %v1499_v46 = vadd.f32 %v1497_v31, %v1451_v34 }
 0x1aa   : > { %v1170_v47 = vmul.f32 1.442695, %v1167_v36  ;;  %v1166_v48 = vmul.f32 %v2563_v42, %v1164_v37  ;;  %v1279_v49 = vmul.f32 %v1270_v38, %v830_v63  ;;  %v1450_v50 = vmul.f32 %v1441_v40, %v830_v63 }
 0x1ab   : > { %2572 = vpow2.f32 %v998_v43  ;;  %v996_v52 = vmul.f32 1.442695, %v994_v44  ;;  %v1336_v53 = vmul.f32 %v1328_v45, %v1328_v45  ;;  %v1507_v54 = vmul.f32 %v1499_v46, %v1499_v46 }
 0x1ac   : > { %2574 = vpow2.f32 %v1170_v47  ;;  %v1168_v56 = vmul.f32 1.442695, %v1166_v48  ;;  %v1327_v57 = vadd.f32 %v1325_v39, %v1279_v49  ;;  %v1498_v58 = vadd.f32 %v1496_v41, %v1450_v50  ;;  %v2871_v48 = vld [vmem:[%s3026_s1 + $0x8] sm:$0xff]  ;;  %v2876_v49 = vld [vmem:[%s3026_s1] sm:$0xff] }
 0x1ad   : > { %2576 = vpow2.f32 %v996_v52  ;;  %v1338_v59 = vmul.f32 %v2565_v51, %v1336_v53  ;;  %v1509_v60 = vmul.f32 %v2567_v55, %v1507_v54  ;;  %2397 = vmatpush3.msra.mxu0 %v2871_v48 }
 0x1ae   : > { %2578 = vpow2.f32 %v1168_v56  ;;  %v1335_v62 = vmul.f32 %v1327_v57, %v1327_v57  ;;  %v1506_v3 = vmul.f32 %v1498_v58, %v1498_v58  ;;  %2398 = vmatprep.subr.mxu0 %v2628_v0 }
 0x1af   : > { %v1341_v5 = vmul.f32 1.442695, %v1338_v59  ;;  %v1512_v63 = vmul.f32 1.442695, %v1509_v60  ;;  %2399 = vmatpush3.msra.mxu0 %v2876_v49 }
 0x1b0   : > { %v1337_v8 = vmul.f32 %v2569_v61, %v1335_v62  ;;  %v1508_v9 = vmul.f32 %v2571_v4, %v1506_v3 }
 0x1b1   : > { %2580 = vpow2.f32 %v1341_v5 }
 0x1b2   : > { %2582 = vpow2.f32 %v1512_v63  ;;  %v1339_v12 = vmul.f32 1.442695, %v1337_v8  ;;  %v1510_v14 = vmul.f32 1.442695, %v1508_v9 }
 0x1b4   : > { %2584 = vpow2.f32 %v1339_v12 }
 0x1b5   : > { %2586 = vpow2.f32 %v1510_v14 }
 0x1b8   : > { %v2573_v15 = vpop.eup %2572 }
 0x1b9   : > { %v2575_v16 = vpop.eup %2574  ;;  %v1001_v17 = vmul.f32 4.0, %v2573_v15 }
 0x1ba   : > { %v2577_v18 = vpop.eup %2576  ;;  %v1173_v19 = vmul.f32 4.0, %v2575_v16 }
 0x1bb   : > { %v2579_v20 = vpop.eup %2578  ;;  %v1004_v21 = vmul.f32 1.442695, %v1001_v17  ;;  %v1000_v22 = vmul.f32 4.0, %v2577_v18 }
 0x1bc   : > { %v1176_v1 = vmul.f32 1.442695, %v1173_v19  ;;  %v1172_v2 = vmul.f32 4.0, %v2579_v20 }
 0x1bd   : > { %2588 = vpow2.f32 %v1004_v21  ;;  %v1002_v13 = vmul.f32 1.442695, %v1000_v22 }
 0x1be   : > { %v2581_v23 = vpop.eup %2580  ;;  %2590 = vpow2.f32 %v1176_v1  ;;  %v1174_v24 = vmul.f32 1.442695, %v1172_v2 }
 0x1bf   : > { %v2583_v10 = vpop.eup %2582  ;;  %2592 = vpow2.f32 %v1002_v13  ;;  %v1344_v25 = vmul.f32 4.0, %v2581_v23 }
 0x1c0   : > { %2594 = vpow2.f32 %v1174_v24  ;;  %v1515_v26 = vmul.f32 4.0, %v2583_v10 }
 0x1c1   : > { %v2585_v11 = vpop.eup %2584  ;;  %v1347_v27 = vmul.f32 1.442695, %v1344_v25 }
 0x1c2   : > { %v2587_v28 = vpop.eup %2586  ;;  %v1343_v29 = vmul.f32 4.0, %v2585_v11  ;;  %v1518_v30 = vmul.f32 1.442695, %v1515_v26 }
 0x1c3   : > { %v1514_v31 = vmul.f32 4.0, %v2587_v28  ;;  %2596 = vpow2.f32 %v1347_v27 }
 0x1c4   : > { %v1345_v6 = vmul.f32 1.442695, %v1343_v29 }
 0x1c5   : > { %v1516_v32 = vmul.f32 1.442695, %v1514_v31 }
 0x1c6   : > { %2598 = vpow2.f32 %v1345_v6 }
 0x1c7   : > { %2600 = vpow2.f32 %v1518_v30 }
 0x1c8   : > { %2602 = vpow2.f32 %v1516_v32 }
 0x1ca   : > { %v2589_v33 = vpop.eup %2588 }
 0x1cb   : > { %v2591_v7 = vpop.eup %2590  ;;  %v1010_v34 = vsel %vm1006_vm2, %v2589_v33, 0.0 }
 0x1cc   : > { %v2593_v35 = vpop.eup %2592  ;;  %v1181_v36 = vsel %vm1006_vm2, %v2591_v7, 0.0  ;;  %1011 = vadd.xlane.f32.xlu0 %v1010_v34 }
 0x1cd   : > { %v2595_v37 = vpop.eup %2594  ;;  %1182 = vadd.xlane.f32.xlu1 %v1181_v36  ;;  %v1007_v38 = vsel %vm1006_vm2, %v2593_v35, 0.0 }
 0x1ce   : > { %v1178_v39 = vsel %vm1006_vm2, %v2595_v37, 0.0 }
 0x1d0   : > { %1008 = vadd.xlane.f32.xlu0 %v1007_v38  ;;  %v2597_v40 = vpop.eup %2596  ;;  %v1786_v38 = vld [vmem:[%s2898_s13 + $0x78] sm:$0xff] }
 0x1d1   : > { %1179 = vadd.xlane.f32.xlu1 %v1178_v39  ;;  %v1352_v43 = vsel %vm1006_vm2, %v2597_v40, 0.0  ;;  %v1785_v39 = vld [vmem:[%s2898_s13 + $0x70] sm:$0xff]  ;;  %2408 = vmatprep.subr.msk.mxu0 %vm1787_vm3, %v1786_v38 }
 0x1d3   : > { %v2599_v41 = vpop.eup %2598 }
 0x1d4   : > { %v2601_v42 = vpop.eup %2600  ;;  %v1349_v44 = vsel %vm1006_vm2, %v2599_v41, 0.0 }
 0x1d5   : > { %v2603_v45 = vpop.eup %2602  ;;  %1353 = vadd.xlane.f32.xlu1 %v1352_v43  ;;  %1350 = vadd.xlane.f32.xlu0 %v1349_v44  ;;  %v1523_v46 = vsel %vm1006_vm2, %v2601_v42, 0.0  ;;  %v1781_v43 = vld [vmem:[%s2898_s13 + $0x50] sm:$0xff]  ;;  %v1780_v44 = vld [vmem:[%s2898_s13 + $0x48] sm:$0xff] }
 0x1d6   : > { %v1520_v47 = vsel %vm1006_vm2, %v2603_v45, 0.0 }
 0x1d9   : > { %1524 = vadd.xlane.f32.xlu1 %v1523_v46  ;;  %1521 = vadd.xlane.f32.xlu0 %v1520_v47  ;;  %v1778_v46 = vld [vmem:[%s2898_s13 + $0x38] sm:$0xff]  ;;  %v1777_v47 = vld [vmem:[%s2898_s13 + $0x30] sm:$0xff] }
 0x255   : > { %v1012_v50 = vpop.xlane.xlu0 %1011 }
 0x256   : > { %v1183_v51 = vpop.xlane.xlu1 %1182  ;;  %2604 = vrcp.f32 %v1012_v50  ;;  %v1776_v50 = vld [vmem:[%s2898_s13 + $0x28] sm:$0xff] }
 0x257   : > { %2606 = vrcp.f32 %v1183_v51  ;;  %v1775_v51 = vld [vmem:[%s2898_s13 + $0x20] sm:$0xff] }
 0x259   : > { %v1009_v52 = vpop.xlane.xlu0 %1008 }
 0x25a   : > { %v1180_v53 = vpop.xlane.xlu1 %1179  ;;  %2608 = vrcp.f32 %v1009_v52  ;;  %v1774_v52 = vld [vmem:[%s2898_s13 + $0x18] sm:$0xff] }
 0x25b   : > { %2610 = vrcp.f32 %v1180_v53  ;;  %v1773_v53 = vld [vmem:[%s2898_s13 + $0x10] sm:$0xff] }
 0x25e   : > { %v1354_v54 = vpop.xlane.xlu1 %1353  ;;  %v1351_v55 = vpop.xlane.xlu0 %1350 }
 0x25f   : > { %2612 = vrcp.f32 %v1354_v54 }
 0x260   : > { %2614 = vrcp.f32 %v1351_v55  ;;  %v1770_v55 = vld [vmem:[%s2949_s16 + $0x78] sm:$0xff] }
 0x262   : > { %v1525_v56 = vpop.xlane.xlu1 %1524  ;;  %v1522_v57 = vpop.xlane.xlu0 %1521 }
 0x263   : > { %2616 = vrcp.f32 %v1525_v56  ;;  %v2605_v58 = vpop.eup %2604 }
 0x264   : > { %2618 = vrcp.f32 %v1522_v57  ;;  %v2607_v0 = vpop.eup %2606  ;;  %v1016_v62 = vmul.f32 1.25, %v2605_v58  ;;  %v1769_v57 = vld [vmem:[%s2949_s16 + $0x70] sm:$0xff]  ;;  %v1768_v58 = vld [vmem:[%s2949_s16 + $0x68] sm:$0xff] }
 0x265   : > { %v1187_v61 = vmul.f32 1.25, %v2607_v0  ;;  %v1767_v0 = vld [vmem:[%s2949_s16 + $0x60] sm:$0xff] }
 0x266   : > { %v1018_v9 = vmul.f32 %v2589_v33, %v1016_v62  ;;  %v1763_v62 = vld [vmem:[%s2949_s16 + $0x40] sm:$0xff] }
 0x267   : > { %v2609_v59 = vpop.eup %2608  ;;  %v1189_v8 = vmul.f32 %v2591_v7, %v1187_v61  ;;  %v1764_v61 = vld [vmem:[%s2949_s16 + $0x48] sm:$0xff] }
 0x268   : > { %v2611_v60 = vpop.eup %2610  ;;  %v1014_v4 = vmul.f32 1.25, %v2609_v59  ;;  %v1766_v59 = vld [vmem:[%s2949_s16 + $0x58] sm:$0xff] }
 0x269   : > { %v1185_v3 = vmul.f32 1.25, %v2611_v60  ;;  %v1191_v21 = vadd.f32 %v1189_v8, %v1018_v9  ;;  %v1765_v60 = vld [vmem:[%s2949_s16 + $0x50] sm:$0xff]  ;;  %v1758_v8 = vld [vmem:[%s2949_s16 + $0x18] sm:$0xff] }
 0x26a   : > { %v1017_v15 = vmul.f32 %v2593_v35, %v1014_v4  ;;  %v1761_v4 = vld [vmem:[%s2949_s16 + $0x30] sm:$0xff] }
 0x26b   : > { %v1188_v14 = vmul.f32 %v2595_v37, %v1185_v3  ;;  %v1762_v3 = vld [vmem:[%s2949_s16 + $0x38] sm:$0xff]  ;;  %v1757_v9 = vld [vmem:[%s2949_s16 + $0x10] sm:$0xff] }
 0x26c   : > { %v2613_v5 = vpop.eup %2612 }
 0x26d   : > { %v2615_v63 = vpop.eup %2614  ;;  %v1358_v12 = vmul.f32 1.25, %v2613_v5  ;;  %v1190_v1 = vadd.f32 %v1188_v14, %v1017_v15  ;;  %v1760_v5 = vld [vmem:[%s2949_s16 + $0x28] sm:$0xff]  ;;  %v1771_v15 = vld [vmem:[%s2898_s13] sm:$0xff] }
 0x26e   : > { %v1356_v16 = vmul.f32 1.25, %v2615_v63  ;;  %v1759_v63 = vld [vmem:[%s2949_s16 + $0x20] sm:$0xff]  ;;  %v1756_v14 = vld [vmem:[%s2949_s16 + $0x8] sm:$0xff] }
 0x26f   : > { %v1360_v17 = vmul.f32 %v2597_v40, %v1358_v12  ;;  %v1784_v40 = vld [vmem:[%s2898_s13 + $0x68] sm:$0xff] }
 0x270   : > { %v2617_v18 = vpop.eup %2616  ;;  %v1359_v19 = vmul.f32 %v2599_v41, %v1356_v16  ;;  %v1783_v41 = vld [vmem:[%s2898_s13 + $0x60] sm:$0xff]  ;;  %v1772_v12 = vld [vmem:[%s2898_s13 + $0x8] sm:$0xff] }
 0x271   : > { %v2619_v20 = vpop.eup %2618  ;;  %v1529_v22 = vmul.f32 1.25, %v2617_v18  ;;  %v1362_v13 = vadd.f32 %v1360_v17, %v1191_v21  ;;  %v1755_v16 = vld [vmem:[%s2949_s16] sm:$0xff] }
 0x272   : > { %v1527_v2 = vmul.f32 1.25, %v2619_v20  ;;  %v1361_v24 = vadd.f32 %v1359_v19, %v1190_v1  ;;  %v1750_v1 = vstv %s1741_s18 }
 0x273   : > { %v1531_v23 = vmul.f32 %v2601_v42, %v1529_v22  ;;  %v1782_v42 = vld [vmem:[%s2898_s13 + $0x58] sm:$0xff] }
 0x274   : > { %v1530_v10 = vmul.f32 %v2603_v45, %v1527_v2  ;;  %v1779_v45 = vld [vmem:[%s2898_s13 + $0x40] sm:$0xff] }
 0x275   : > { %v2881_v25 = vadd.f32 %v1531_v23, %v1362_v13  ;;  %v1743_v13 = vstv %s1742_s19 }
 0x276   : > { %v1532_v26 = vadd.f32 %v1530_v10, %v1361_v24 }
 0x277   : > { %v1723_v11 = vsel %vm1006_vm2, %v2881_v25, 0.0 }
 0x278   : > { %1536 = vxpose.xlu0.b32.start [1/2] (short) (narrow) %v1532_v26, 8  ;;  %2405 = vmatprep.mubr.msk.f32.mxu1 %vm1006_vm2, %v1532_v26  ;;  %v1722_v27 = vsel %vm1006_vm2, %v1532_v26, 0.0 }
 0x279   : > { %v1724_v28 = vadd.f32 %v1723_v11, %v1722_v27 }
 0x27b   : > { %v1725_v29 = vrot.slane %v1724_v28, 4 }
 0x27c   : > { %1537 = vxpose.xlu0.b32.end [2/2] (short) (narrow) %v2881_v25, 8 }
 0x27d   : > { %v1726_v30 = vadd.f32 %v1725_v29, %v1724_v28  ;;  %v2275_v28 = vld [vmem:[%s399_s21] ss:$0 sm:$0xff] }
 0x27f   : > { %v1727_v31 = vrot.slane %v1726_v30, 2 }
 0x281   : > { %v1728_v6 = vadd.f32 %v1727_v31, %v1726_v30 }
 0x283   : > { %v1729_v32 = vrot.slane %v1728_v6, 1 }
 0x285   : > { %v1730_v33 = vadd.f32 %v1729_v32, %v1728_v6 }
 0x287   : > { %v1731_v7 = vmul.f32 %v1730_v33, %v1532_v26  ;;  %v1732_v35 = vmul.f32 %v1730_v33, %v2881_v25 }
 0x289   : > { %v1733_v34 = vsel %vm1006_vm2, %v1731_v7, 0.0  ;;  %v1736_v36 = vsel %vm1006_vm2, %v1732_v35, 0.0 }
 0x28a   : > { %1734 = vadd.xlane.f32.xlu1 %v1733_v34 }
 0x28e   : > { %1737 = vadd.xlane.f32.xlu1 %v1736_v36 }
 0x2f4   : > { %v1552_v37 = vpop.trf.xlu0 }
 0x2f5   : > { %2401 = vmatmul.mubr.msk.f32.vlgmr.msra.gmra.mxu0 %vm408_vm1, %v1552_v37 }
 0x2f6   : > { %2440 = vmatprep.mubr.msk.f32.mxu0 %vm1787_vm3, %v2876_v49  ;;  %2409 = vmatpush3.xpose.msk.msra.mxu0 %vm1787_vm3, %v1786_v38 }
 0x2f7   : > { %2410 = vmatprep.subr.msk.mxu0 %vm1787_vm3, %v1785_v39 }
 0x2fa   : > { %2411 = vmatpush3.xpose.msk.msra.mxu0 %vm1787_vm3, %v1785_v39 }
 0x2fb   : > { %2412 = vmatprep.subr.msk.mxu0 %vm1787_vm3, %v1784_v40 }
 0x2fe   : > { %2413 = vmatpush3.xpose.msk.msra.mxu0 %vm1787_vm3, %v1784_v40 }
 0x2ff   : > { %2414 = vmatprep.subr.msk.mxu0 %vm1787_vm3, %v1783_v41 }
 0x302   : > { %2415 = vmatpush3.xpose.msk.msra.mxu0 %vm1787_vm3, %v1783_v41 }
 0x303   : > { %2416 = vmatprep.subr.msk.mxu0 %vm1787_vm3, %v1782_v42 }
 0x306   : > { %2417 = vmatpush3.xpose.msk.msra.mxu0 %vm1787_vm3, %v1782_v42 }
 0x307   : > { %2418 = vmatprep.subr.msk.mxu0 %vm1787_vm3, %v1781_v43 }
 0x30a   : > { %2419 = vmatpush3.xpose.msk.msra.mxu0 %vm1787_vm3, %v1781_v43 }
 0x30b   : > { %2420 = vmatprep.subr.msk.mxu0 %vm1787_vm3, %v1780_v44 }
 0x30e   : > { %2421 = vmatpush3.xpose.msk.msra.mxu0 %vm1787_vm3, %v1780_v44 }
 0x30f   : > { %2422 = vmatprep.subr.msk.mxu0 %vm1787_vm3, %v1779_v45 }
 0x312   : > { %2423 = vmatpush3.xpose.msk.msra.mxu0 %vm1787_vm3, %v1779_v45 }
 0x313   : > { %2424 = vmatprep.subr.msk.mxu0 %vm1787_vm3, %v1778_v46  ;;  %v1735_v17 = vpop.xlane.xlu1 %1734 }
 0x314   : > { %v1746_v21 = vmul.f32 %v1735_v17, %v2876_v49 }
 0x316   : > { %2425 = vmatpush3.xpose.msk.msra.mxu0 %vm1787_vm3, %v1778_v46 }
 0x317   : > { %2426 = vmatprep.subr.msk.mxu0 %vm1787_vm3, %v1777_v47  ;;  %v1738_v18 = vpop.xlane.xlu1 %1737 }
 0x318   : > { %v1747_v19 = vmul.f32 %v1738_v18, %v2871_v48 }
 0x31a   : > { %2427 = vmatpush3.xpose.msk.msra.mxu0 %vm1787_vm3, %v1777_v47 }
 0x31b   : > { %2428 = vmatprep.subr.msk.mxu0 %vm1787_vm3, %v1776_v50 }
 0x31e   : > { %2429 = vmatpush3.xpose.msk.msra.mxu0 %vm1787_vm3, %v1776_v50 }
 0x31f   : > { %2430 = vmatprep.subr.msk.mxu0 %vm1787_vm3, %v1775_v51 }
 0x322   : > { %2431 = vmatpush3.xpose.msk.msra.mxu0 %vm1787_vm3, %v1775_v51 }
 0x323   : > { %2432 = vmatprep.subr.msk.mxu0 %vm1787_vm3, %v1774_v52 }
 0x326   : > { %2433 = vmatpush3.xpose.msk.msra.mxu0 %vm1787_vm3, %v1774_v52 }
 0x327   : > { %2434 = vmatprep.subr.msk.mxu0 %vm1787_vm3, %v1773_v53 }
 0x32a   : > { %2435 = vmatpush3.xpose.msk.msra.mxu0 %vm1787_vm3, %v1773_v53 }
 0x32b   : > { %2436 = vmatprep.subr.msk.mxu0 %vm1787_vm3, %v1772_v12 }
 0x32e   : > { %2437 = vmatpush3.xpose.msk.msra.mxu0 %vm1787_vm3, %v1772_v12 }
 0x32f   : > { %2438 = vmatprep.subr.msk.mxu0 %vm1787_vm3, %v1771_v15 }
 0x332   : > { %2439 = vmatpush3.xpose.msk.msra.mxu0 %vm1787_vm3, %v1771_v15 }
 0x335   : > { %2441 = vmatmul.mubr.msk.f32.vlgmr.msra.gmra.mxu0 %vm1787_vm3, %v2871_v48 }
 0x3b5   : > { %v1637_v54 = vpop.f32.mrf.mxu0 }
 0x3b6   : > { %2403 = vmatprep.subr.mxu1 %v1637_v54 }
 0x3b7   : > { %v2402_v56 = vpop.f32.mrf.mxu0  ;;  %2404 = vmatpush3.msra.mxu1 %v1637_v54 }
 0x3b8   : > { %2406 = vmatmul.mubr.msk.f32.vlgmr.msra.gmra.mxu1 %vm1006_vm2, %v2881_v25  ;;  %2443 = vmatprep.subr.msk.mxu1 %vm1787_vm3, %v1770_v55 }
 0x3b9   : > { %2444 = vmatpush3.xpose.msk.msra.mxu1 %vm1787_vm3, %v1770_v55 }
 0x3ba   : > { %2445 = vmatprep.subr.msk.mxu1 %vm1787_vm3, %v1769_v57 }
 0x3bd   : > { %2446 = vmatpush3.xpose.msk.msra.mxu1 %vm1787_vm3, %v1769_v57 }
 0x3be   : > { %2447 = vmatprep.subr.msk.mxu1 %vm1787_vm3, %v1768_v58 }
 0x3c1   : > { %2448 = vmatpush3.xpose.msk.msra.mxu1 %vm1787_vm3, %v1768_v58 }
 0x3c2   : > { %2449 = vmatprep.subr.msk.mxu1 %vm1787_vm3, %v1767_v0 }
 0x3c5   : > { %2450 = vmatpush3.xpose.msk.msra.mxu1 %vm1787_vm3, %v1767_v0 }
 0x3c6   : > { %2451 = vmatprep.subr.msk.mxu1 %vm1787_vm3, %v1766_v59 }
 0x3c9   : > { %2452 = vmatpush3.xpose.msk.msra.mxu1 %vm1787_vm3, %v1766_v59 }
 0x3ca   : > { %2453 = vmatprep.subr.msk.mxu1 %vm1787_vm3, %v1765_v60 }
 0x3cd   : > { %2454 = vmatpush3.xpose.msk.msra.mxu1 %vm1787_vm3, %v1765_v60 }
 0x3ce   : > { %2455 = vmatprep.subr.msk.mxu1 %vm1787_vm3, %v1764_v61 }
 0x3d1   : > { %2456 = vmatpush3.xpose.msk.msra.mxu1 %vm1787_vm3, %v1764_v61 }
 0x3d2   : > { %2457 = vmatprep.subr.msk.mxu1 %vm1787_vm3, %v1763_v62 }
 0x3d5   : > { %2458 = vmatpush3.xpose.msk.msra.mxu1 %vm1787_vm3, %v1763_v62 }
 0x3d6   : > { %2459 = vmatprep.subr.msk.mxu1 %vm1787_vm3, %v1762_v3 }
 0x3d9   : > { %2460 = vmatpush3.xpose.msk.msra.mxu1 %vm1787_vm3, %v1762_v3 }
 0x3da   : > { %2461 = vmatprep.subr.msk.mxu1 %vm1787_vm3, %v1761_v4 }
 0x3dd   : > { %2462 = vmatpush3.xpose.msk.msra.mxu1 %vm1787_vm3, %v1761_v4 }
 0x3de   : > { %2463 = vmatprep.subr.msk.mxu1 %vm1787_vm3, %v1760_v5 }
 0x3e1   : > { %2464 = vmatpush3.xpose.msk.msra.mxu1 %vm1787_vm3, %v1760_v5 }
 0x3e2   : > { %2465 = vmatprep.subr.msk.mxu1 %vm1787_vm3, %v1759_v63 }
 0x3e5   : > { %2466 = vmatpush3.xpose.msk.msra.mxu1 %vm1787_vm3, %v1759_v63 }
 0x3e6   : > { %2467 = vmatprep.subr.msk.mxu1 %vm1787_vm3, %v1758_v8 }
 0x3e9   : > { %2468 = vmatpush3.xpose.msk.msra.mxu1 %vm1787_vm3, %v1758_v8 }
 0x3ea   : > { %2469 = vmatprep.subr.msk.mxu1 %vm1787_vm3, %v1757_v9 }
 0x3ed   : > { %2470 = vmatpush3.xpose.msk.msra.mxu1 %vm1787_vm3, %v1757_v9 }
 0x3ee   : > { %2471 = vmatprep.subr.msk.mxu1 %vm1787_vm3, %v1756_v14 }
 0x3f1   : > { %2472 = vmatpush3.xpose.msk.msra.mxu1 %vm1787_vm3, %v1756_v14 }
 0x3f2   : > { %2473 = vmatprep.subr.msk.mxu1 %vm1787_vm3, %v1755_v16 }
 0x3f5   : > { %2474 = vmatpush3.xpose.msk.msra.mxu1 %vm1787_vm3, %v1755_v16  ;;  %v2442_v48 = vpop.f32.mrf.mxu0 }
 0x3f7   : > { %v1908_v30 = vpop.f32.mrf.mxu0 }
 0x478   : > { %v2407_v20 = vpop.f32.mrf.mxu1 }
 0x479   : > { %v1749_v22 = vsub.f32 %v1747_v19, %v2407_v20  ;;  %v1745_v26 = vmul.f32 %v2407_v20, %v1743_v13 }
 0x47a   : > { %v1713_v2 = vpop.f32.mrf.mxu1 }
 0x47b   : > { %v1748_v23 = vsub.f32 %v1746_v21, %v1713_v2  ;;  %v1752_v24 = vmul.f32 %v1750_v1, %v1749_v22  ;;  %v1744_v10 = vmul.f32 %v1743_v13, %v1713_v2 }
 0x47d   : > { %v1751_v25 = vmul.f32 %v1750_v1, %v1748_v23  ;;  %v1754_v27 = vadd.f32 %v1752_v24, %v1745_v26 }
 0x47f   : > { %v1753_v11 = vadd.f32 %v1751_v25, %v1744_v10 }
 0x481   : > { %2475 = vmatprep.mubr.msk.f32.mxu1 %vm1787_vm3, %v1753_v11 }
 0x482   : > { %2476 = vmatmul.mubr.msk.f32.vlgmr.msra.gmra.mxu1 %vm1787_vm3, %v1754_v27 }
 0x542   : > { %v2477_v49 = vpop.f32.mrf.mxu1 }
 0x543   : > { %v2043_v29 = vadd.f32 %v2477_v49, %v2442_v48 }
 0x544   : > { %v2037_v31 = vpop.f32.mrf.mxu1 }
 0x545   : > { %v2054_v6 = vadd.f32 %v2275_v28, %v2043_v29  ;;  %v2038_v32 = vadd.f32 %v2037_v31, %v1908_v30 }
 0x547   : > { %2056 = vst [vmem:[%s404_s25 + $0x8] sm:$0xff] %v2054_v6  ;;  %v2053_v33 = vadd.f32 %v2275_v28, %v2038_v32 }
 0x549   : > { %2055 = vst [vmem:[%s404_s25] sm:$0xff] %v2053_v33 }
 0x54a PF: > { %s18_s27 = sadd.s32 1, %s2626_s27  }
 0x54b   : > { %p15_p5 = scmp.ge.s32.totalorder %s18_s27, 4  }
 0x54d   :  { %17 = sbr.rel (!%p15_p5) target bundleno = 1 (0x1), region = 106 }

</bundles_post_ra>
